<compile_context>
chip_gen: v7x
topology: tpu7x:2x2x1
jax: 0.10.0
libtpu: 0.0.40
codegen_flags: <defaults>
</compile_context>

<pallas_src>
import math

import jax
import jax.numpy as jnp
import numpy as np
from jax import lax
from jax.experimental import pallas as pl
from jax.experimental.pallas import tpu as pltpu

NEG_INF = -1e30  # finite mask value: avoids exp(-inf - (-inf)) NaN pitfalls


def _round_up(x, m):
    return (x + m - 1) // m * m


def _pick_tile(dim, preferred, minimum=128):
    """Tile <= preferred. Prefers an exact divisor of dim (halving down to
    `minimum`); dim <= preferred returns the full extent (always a legal
    block). If no divisor is found the caller zero-pads to a tile multiple."""
    if dim <= preferred:
        return dim
    t = preferred
    while t > minimum and dim % t:
        t //= 2
    return t


# ---------------------------------------------------------------------------
# Tiled linear kernel:  y = x @ W^T + b   (W^T pre-materialized on the host)
# ---------------------------------------------------------------------------

def _linear_kernel(x_ref, w_ref, b_ref, o_ref, acc_ref):
    k = pl.program_id(2)

    @pl.when(k == 0)
    def _():
        acc_ref[...] = jnp.zeros_like(acc_ref)

    # bf16 operands, f32 MXU accumulation.
    acc_ref[...] += jnp.dot(x_ref[...], w_ref[...],
                            preferred_element_type=jnp.float32)

    @pl.when(k == pl.num_programs(2) - 1)
    def _():
        o_ref[...] = (acc_ref[...] + b_ref[...]).astype(o_ref.dtype)


def pallas_linear(x2d, w_t, b, *, tm=512, tn=512, tk=1024, out_dtype=None):
    """x2d: (M, K), w_t: (K, N) (already transposed), b: (N,) -> (M, N)."""
    M, K = x2d.shape
    Kw, N = w_t.shape
    assert K == Kw
    out_dtype = x2d.dtype if out_dtype is None else out_dtype

    tm, tn, tk = _pick_tile(M, tm), _pick_tile(N, tn), _pick_tile(K, tk)
    Mp, Np, Kp = _round_up(M, tm), _round_up(N, tn), _round_up(K, tk)
    if (Mp, Kp) != (M, K):
        x2d = jnp.pad(x2d, ((0, Mp - M), (0, Kp - K)))
    if (Kp, Np) != (K, N):
        w_t = jnp.pad(w_t, ((0, Kp - K), (0, Np - N)))
    if Np != N:
        b = jnp.pad(b, (0, Np - N))

    grid = (Mp // tm, Np // tn, Kp // tk)
    in_bytes = jnp.dtype(x2d.dtype).itemsize
    cost = pl.CostEstimate(
        flops=2 * Mp * Np * Kp,
        transcendentals=0,
        bytes_accessed=in_bytes * (Mp * Kp + Kp * Np)
        + jnp.dtype(out_dtype).itemsize * Mp * Np)

    # TODO(synk): on v5e add pipeline_mode=pl.Buffered(3) to the weight spec if
    # the profile shows exposed DMA after the bf16 cast.
    out = pl.pallas_call(
        _linear_kernel,
        out_shape=jax.ShapeDtypeStruct((Mp, Np), out_dtype),
        grid=grid,
        in_specs=[
            pl.BlockSpec((tm, tk), lambda i, j, k: (i, k)),
            pl.BlockSpec((tk, tn), lambda i, j, k: (k, j)),
            pl.BlockSpec((1, tn), lambda i, j, k: (0, j)),
        ],
        out_specs=pl.BlockSpec((tm, tn), lambda i, j, k: (i, j)),
        scratch_shapes=[pltpu.VMEM((tm, tn), jnp.float32)],
        compiler_params=pltpu.CompilerParams(
            dimension_semantics=("parallel", "parallel", "arbitrary")),
        cost_estimate=cost,
    )(x2d, w_t, b.reshape(1, Np).astype(jnp.float32))

    if (Mp, Np) != (M, N):
        out = out[:M, :N]
    return out


# ---------------------------------------------------------------------------
# Flash-attention style causal attention over a triangular block grid
# ---------------------------------------------------------------------------

def _flash_attn_kernel(qi_tab, kv_tab, q_ref, k_ref, v_ref, o_ref,
                       m_sc, l_sc, acc_sc):
    step = pl.program_id(2)
    qi = qi_tab[step]          # query-block row of this step
    kv = kv_tab[step]          # kv-block column of this step (kv <= qi always)

    @pl.when(kv == 0)
    def _():
        m_sc[...] = jnp.full_like(m_sc, NEG_INF)
        l_sc[...] = jnp.zeros_like(l_sc)
        acc_sc[...] = jnp.zeros_like(acc_sc)

    def scores():
        # q @ k^T without an explicit transpose (contract the last dims);
        # bf16 operands, f32 MXU accumulation. 1/sqrt(D) is folded into Wq.
        return lax.dot_general(
            q_ref[...], k_ref[...],
            dimension_numbers=(((1,), (1,)), ((), ())),
            preferred_element_type=jnp.float32)

    def online_update(s):
        m_prev = m_sc[...]
        m_new = jnp.maximum(m_prev, jnp.max(s, axis=-1, keepdims=True))
        alpha = jnp.exp(m_prev - m_new)
        p = jnp.exp(s - m_new)                     # unnormalized weights, f32
        l_sc[...] = alpha * l_sc[...] + jnp.sum(p, axis=-1, keepdims=True)
        acc_sc[...] = alpha * acc_sc[...] + jnp.dot(
            p.astype(v_ref.dtype), v_ref[...],
            preferred_element_type=jnp.float32)
        m_sc[...] = m_new

    # Strictly-below-diagonal blocks: completely unmasked — no iota/where cost.
    @pl.when(kv < qi)
    def _():
        online_update(scores())

    # Diagonal block: apply the causal mask, update, then normalize once with
    # a (tq, 1) approx reciprocal (EUP) instead of a (T, T) divide.
    @pl.when(kv == qi)
    def _():
        s = scores()
        tq, tkv = s.shape
        row = lax.broadcasted_iota(jnp.int32, (tq, tkv), 0)
        col = lax.broadcasted_iota(jnp.int32, (tq, tkv), 1)
        s = jnp.where(row >= col, s, NEG_INF)      # tq == tkv: local mask exact
        online_update(s)
        inv_l = pl.reciprocal(l_sc[...], approx=True)
        o_ref[...] = (acc_sc[...] * inv_l).astype(o_ref.dtype)


def pallas_causal_attention(qkv_heads, n_head, *, tq=256):
    """qkv_heads: (3*H, B, T, D) head-major fused QKV -> (H, B, T, D).

    Head-group g along axis 0: q head h at g = h, k at n_head + h,
    v at 2*n_head + h.
    """
    three_h, B, T, D = qkv_heads.shape
    assert three_h == 3 * n_head
    tq = _pick_tile(T, tq, minimum=128)
    # TODO(synk): pad + mask ragged T instead of requiring exact divisibility.
    assert T % tq == 0, f"T={T} must be divisible by the attention tile {tq}"
    tkv = tq                   # equal tiles keep the diagonal-block logic exact
    n_q = T // tq

    # Triangular step enumeration: only kv <= qi blocks get grid steps / DMA.
    pairs = [(i, j) for i in range(n_q) for j in range(i + 1)]
    qi_tab = jnp.asarray(np.array([p[0] for p in pairs], dtype=np.int32))
    kv_tab = jnp.asarray(np.array([p[1] for p in pairs], dtype=np.int32))
    n_steps = len(pairs)

    q_spec = pl.BlockSpec(
        (None, None, tq, D), lambda b, h, s, qi_t, kv_t: (h, b, qi_t[s], 0))
    k_spec = pl.BlockSpec(
        (None, None, tkv, D),
        lambda b, h, s, qi_t, kv_t: (n_head + h, b, kv_t[s], 0))
    v_spec = pl.BlockSpec(
        (None, None, tkv, D),
        lambda b, h, s, qi_t, kv_t: (2 * n_head + h, b, kv_t[s], 0))
    o_spec = pl.BlockSpec(
        (None, None, tq, D), lambda b, h, s, qi_t, kv_t: (h, b, qi_t[s], 0))

    el = jnp.dtype(qkv_heads.dtype).itemsize
    cost = pl.CostEstimate(
        flops=4 * B * n_head * D * tq * tkv * n_steps,           # QK^T + PV
        transcendentals=B * n_head * tq * tkv * n_steps,         # exp
        bytes_accessed=el * B * n_head * D * (2 * T + 2 * tkv * n_steps))

    return pl.pallas_call(
        _flash_attn_kernel,
        out_shape=jax.ShapeDtypeStruct((n_head, B, T, D), qkv_heads.dtype),
        grid_spec=pltpu.PrefetchScalarGridSpec(
            num_scalar_prefetch=2,
            grid=(B, n_head, n_steps),
            in_specs=[q_spec, k_spec, v_spec],
            out_specs=o_spec,
            scratch_shapes=[
                pltpu.VMEM((tq, 1), jnp.float32),     # running max m
                pltpu.VMEM((tq, 1), jnp.float32),     # running denom l
                pltpu.VMEM((tq, D), jnp.float32),     # output accumulator
            ]),
        compiler_params=pltpu.CompilerParams(
            dimension_semantics=("parallel", "parallel", "arbitrary")),
        cost_estimate=cost,
    )(qi_tab, kv_tab, qkv_heads, qkv_heads, qkv_heads)


# ---------------------------------------------------------------------------
# Module forward
# ---------------------------------------------------------------------------

def causal_self_attention(x, params, n_head, *, attn_tile=256):
    """Forward pass matching the PyTorch CausalSelfAttention module."""
    B, T, C = x.shape
    assert C % n_head == 0
    D = C // n_head

    scale = 1.0 / math.sqrt(D)
    # Fused QKV weights (nn.Linear: y = x @ W^T + b); the 1/sqrt(D) attention
    # scale is folded into the query projection so no kernel ever applies it.
    wqkv_t = jnp.concatenate(
        [params["wq"].T * scale, params["wk"].T, params["wv"].T],
        axis=1).astype(jnp.bfloat16)
    bqkv = jnp.concatenate(
        [params["bq"] * scale, params["bk"], params["bv"]], axis=0)

    x2d = x.reshape(B * T, C).astype(jnp.bfloat16)
    qkv = pallas_linear(x2d, wqkv_t, bqkv, out_dtype=jnp.bfloat16)  # (B*T, 3C)

    # Rearrange head-major so attention blocks are (tq, D) with D the full
    # minor extent — this is what makes GPT-2's D = 64 legal (no 64-lane
    # sub-slices of the 3C slab). Column layout of qkv is
    # [q_h0..q_h{H-1}, k_h0.., v_h0..], each D wide.
    # TODO(synk): for D % 128 == 0 slice the (B, T, 3C) slab directly (skips
    # this HBM transpose); for D = 64 pack 2 heads per 128-lane tile to fill
    # the 256-wide v6e/v7x MXU instead of running 64-wide.
    qkv_heads = qkv.reshape(B, T, 3 * n_head, D).transpose(2, 0, 1, 3)

    y = pallas_causal_attention(qkv_heads, n_head, tq=attn_tile)  # (H,B,T,D)
    y2d = y.transpose(1, 2, 0, 3).reshape(B * T, C)               # heads merged

    out = pallas_linear(y2d, params["wo"].T.astype(jnp.bfloat16), params["bo"],
                        out_dtype=jnp.float32)
    return out.reshape(B, T, C)


# ---------------------------------------------------------------------------
# Pure-JAX reference (correctness check)
# ---------------------------------------------------------------------------

def reference(x, params, n_head):
    B, T, C = x.shape
    D = C // n_head
    q = x @ params["wq"].T + params["bq"]
    k = x @ params["wk"].T + params["bk"]
    v = x @ params["wv"].T + params["bv"]
    q = q.reshape(B, T, n_head, D).transpose(0, 2, 1, 3)
    k = k.reshape(B, T, n_head, D).transpose(0, 2, 1, 3)
    v = v.reshape(B, T, n_head, D).transpose(0, 2, 1, 3)
    s = jnp.einsum("bhqd,bhkd->bhqk", q, k) / math.sqrt(D)
    mask = jnp.tril(jnp.ones((T, T), dtype=bool))
    s = jnp.where(mask, s, -jnp.inf)
    p = jax.nn.softmax(s, axis=-1)
    y = jnp.einsum("bhqk,bhkd->bhqd", p, v)
    y = y.transpose(0, 2, 1, 3).reshape(B, T, C)
    return y @ params["wo"].T + params["bo"]


# ---------------------------------------------------------------------------
# Main
# ---------------------------------------------------------------------------

if __name__ == "__main__":
    # GPT-2-shaped but small: the real head_dim of 64, 4 heads, T = 512 so the
    # triangular grid exercises off-diagonal and diagonal kv blocks (tq = 256).
    B, T, n_head, C = 2, 512, 4, 256

    key = jax.random.PRNGKey(0)
    ks = jax.random.split(key, 9)
    x = jax.random.normal(ks[0], (B, T, C), dtype=jnp.float32)

    # nn.Linear weights are (out_features, in_features); biases (out_features,)
    params = {
        "wq": 0.02 * jax.random.normal(ks[1], (C, C), dtype=jnp.float32),
        "bq": 0.02 * jax.random.normal(ks[2], (C,), dtype=jnp.float32),
        "wk": 0.02 * jax.random.normal(ks[3], (C, C), dtype=jnp.float32),
        "bk": 0.02 * jax.random.normal(ks[4], (C,), dtype=jnp.float32),
        "wv": 0.02 * jax.random.normal(ks[5], (C, C), dtype=jnp.float32),
        "bv": 0.02 * jax.random.normal(ks[6], (C,), dtype=jnp.float32),
        "wo": 0.02 * jax.random.normal(ks[7], (C, C), dtype=jnp.float32),
        "bo": 0.02 * jax.random.normal(ks[8], (C,), dtype=jnp.float32),
    }

    out = causal_self_attention(x, params, n_head)
    out = jax.block_until_ready(out)

    ref = reference(x, params, n_head)
    assert out.shape == (B, T, C)
    # bf16 MXU operands with f32 accumulation: expected ~1e-3 abs error vs the
    # pure-f32 reference; a functional bug would show up at the ~1e-1 scale.
    assert jnp.allclose(out, ref, atol=2e-2, rtol=2e-2), "mismatch vs reference"

    print("KERNEL_OK")
</pallas_src>

<mosaic_0001>
module attributes {stable_mosaic.version = 11 : i64} {
  func.func @_linear_kernel(%arg0: i32, %arg1: i32, %arg2: i32, %arg3: memref<512x256xbf16, #tpu.memory_space<vmem>>, %arg4: memref<256x256xbf16, #tpu.memory_space<vmem>>, %arg5: memref<1x256xf32, #tpu.memory_space<vmem>>, %arg6: memref<512x256xbf16, #tpu.memory_space<vmem>>, %arg7: memref<512x256xf32, #tpu.memory_space<vmem>>) attributes {dimension_semantics = [#tpu.dimension_semantics<parallel>, #tpu.dimension_semantics<parallel>, #tpu.dimension_semantics<arbitrary>], iteration_bounds = array<i64: 2, 3, 1>, scalar_prefetch = 0 : i64, scratch_operands = 1 : i64, tpu.core_type = #tpu.core_type<tc>, window_params = [{transform_indices = @transform_0, window_bounds = array<i64: 512, 256>}, {transform_indices = @transform_1, window_bounds = array<i64: 256, 256>}, {transform_indices = @transform_2, window_bounds = array<i64: 1, 256>}, {transform_indices = @transform_3, window_bounds = array<i64: 512, 256>}]} {
    %c0_i32 = arith.constant 0 : i32
    %0 = arith.cmpi eq, %arg2, %c0_i32 : i32
    %1 = arith.extui %0 : i1 to i32
    %c0_i32_0 = arith.constant 0 : i32
    %2 = arith.cmpi ne, %1, %c0_i32_0 : i32
    scf.if %2 {
      %cst_10 = arith.constant 0.000000e+00 : f32
      %12 = vector.broadcast %cst_10 : f32 to vector<512x256xf32>
      %c0_11 = arith.constant 0 : index
      %c0_12 = arith.constant 0 : index
      %13 = vector.load %arg7[%c0_11, %c0_12] : memref<512x256xf32, #tpu.memory_space<vmem>>, vector<512x256xf32>
      tpu.vector_store %arg7[%c0_11, %c0_12], %12 {strides = array<i32>} : memref<512x256xf32, #tpu.memory_space<vmem>>, vector<512x256xf32>,
    } else {
    }
    %c0 = arith.constant 0 : index
    %c0_1 = arith.constant 0 : index
    %3 = vector.load %arg7[%c0, %c0_1] : memref<512x256xf32, #tpu.memory_space<vmem>>, vector<512x256xf32>
    %c0_2 = arith.constant 0 : index
    %c0_3 = arith.constant 0 : index
    %4 = vector.load %arg3[%c0_2, %c0_3] : memref<512x256xbf16, #tpu.memory_space<vmem>>, vector<512x256xbf16>
    %c0_4 = arith.constant 0 : index
    %c0_5 = arith.constant 0 : index
    %5 = vector.load %arg4[%c0_4, %c0_5] : memref<256x256xbf16, #tpu.memory_space<vmem>>, vector<256x256xbf16>
    %cst = arith.constant dense<0.000000e+00> : vector<512x256xf32>
    %6 = tpu.matmul %4, %5, %cst {dimension_numbers = #tpu.dot_dimension_numbers<[1], [0], [0], [1], [0, 0, 1, 1], [], []>} : vector<512x256xbf16>, vector<256x256xbf16>, vector<512x256xf32> -> vector<512x256xf32>
    %7 = arith.addf %3, %6 : vector<512x256xf32>
    %c0_6 = arith.constant 0 : index
    %c0_7 = arith.constant 0 : index
    %8 = vector.load %arg7[%c0_6, %c0_7] : memref<512x256xf32, #tpu.memory_space<vmem>>, vector<512x256xf32>
    tpu.vector_store %arg7[%c0_6, %c0_7], %7 {strides = array<i32>} : memref<512x256xf32, #tpu.memory_space<vmem>>, vector<512x256xf32>,
    %c0_i32_8 = arith.constant 0 : i32
    %9 = arith.cmpi eq, %arg2, %c0_i32_8 : i32
    %10 = arith.extui %9 : i1 to i32
    %c0_i32_9 = arith.constant 0 : i32
    %11 = arith.cmpi ne, %10, %c0_i32_9 : i32
    scf.if %11 {
      %c0_10 = arith.constant 0 : index
      %c0_11 = arith.constant 0 : index
      %12 = vector.load %arg7[%c0_10, %c0_11] : memref<512x256xf32, #tpu.memory_space<vmem>>, vector<512x256xf32>
      %c0_12 = arith.constant 0 : index
      %c0_13 = arith.constant 0 : index
      %13 = vector.load %arg5[%c0_12, %c0_13] : memref<1x256xf32, #tpu.memory_space<vmem>>, vector<1x256xf32>
      %14 = vector.broadcast %13 : vector<1x256xf32> to vector<512x256xf32>
      %15 = arith.addf %12, %14 : vector<512x256xf32>
      %16 = arith.truncf %15 : vector<512x256xf32> to vector<512x256xbf16>
      %c0_14 = arith.constant 0 : index
      %c0_15 = arith.constant 0 : index
      %17 = vector.load %arg6[%c0_14, %c0_15] : memref<512x256xbf16, #tpu.memory_space<vmem>>, vector<512x256xbf16>
      tpu.vector_store %arg6[%c0_14, %c0_15], %16 {strides = array<i32>} : memref<512x256xbf16, #tpu.memory_space<vmem>>, vector<512x256xbf16>,
    } else {
    }
    return
  }
  func.func @transform_0(%arg0: i32, %arg1: i32, %arg2: i32) -> (i32, i32) {
    %c0_i32 = arith.constant 0 : i32
    return %arg0, %arg2 : i32, i32
  }
  func.func @transform_1(%arg0: i32, %arg1: i32, %arg2: i32) -> (i32, i32) {
    %c0_i32 = arith.constant 0 : i32
    return %arg2, %arg1 : i32, i32
  }
  func.func @transform_2(%arg0: i32, %arg1: i32, %arg2: i32) -> (i32, i32) {
    %c0_i32 = arith.constant 0 : i32
    %c0_i32_0 = arith.constant 0 : i32
    return %c0_i32, %arg1 : i32, i32
  }
  func.func @transform_3(%arg0: i32, %arg1: i32, %arg2: i32) -> (i32, i32) {
    %c0_i32 = arith.constant 0 : i32
    return %arg0, %arg1 : i32, i32
  }
}

</mosaic_0001>

<bundles_post_ra>
// kernel: tpu_custom_call.1
= control target key start
LH: loop header
LB: loop body
LE: loop exit
PB: predicated region body
PF: predicated region fallthrough
CT: control target
= control target key end

     0   :  { %s4162_s0 = inlined_call_operand.hbm [shape: bf16[1024,256], index: 0, kind: input, shape index: {}]   ;;  %s4163_s1 = inlined_call_operand.hbm [shape: bf16[256,768], index: 1, kind: input, shape index: {}]   ;;  %s4164_s2 = inlined_call_operand.hbm [shape: f32[1,768], index: 2, kind: input, shape index: {}]   ;;  %s4165_s3 = inlined_call_operand.hbm [shape: bf16[1024,768], index: 3, kind: output, shape index: {}]  }
   0x1   :  { %4183 = sst [smem:[#allocation25_spill]] %s4163_s1 }
   0x2   :  { %4184 = sst [smem:[#allocation26_spill]] %s4165_s3 }
   0x3   :  { %8 = vsyncpa [#allocation4], 0 }
   0x4   :  { %10 = vsyncpa [#allocation4 + $0x1], 0 }
   0x5   :  { %11 = vsyncpa [#allocation7], 0 }
   0x6   :  { %13 = vsyncpa [#allocation7 + $0x1], 0 }
   0x7   :  { %14 = vsyncpa [#allocation5], 0 }
   0x8   :  { %16 = vsyncpa [#allocation5 + $0x1], 0  ;;  %s3467_s12 = smov 0   ;;  %s3469_s13 = smov 0  }
   0x9   :  { %s3471_s14 = smov 0   ;;  %s3473_s15 = smov 0  }
   0xa   :  { %s3475_s16 = smov 0   ;;  %s3477_s17 = smov 0  }
   0xb   :  { %s3479_s18 = smov 0   ;;  %s3481_s19 = smov 0  }
   0xc   :  { %s3483_s20 = smov 0   ;;  %s3485_s21 = smov 0  }
   0xd   :  { %s3487_s22 = smov 0   ;;  %s3489_s23 = smov 0  }
   0xe   :  { %s3491_s24 = smov 0   ;;  %s3493_s25 = smov 0  }
   0xf LB: > { %4185 = sst [smem:[#allocation13_spill]] %s3391_s14  ;;  %s37_s26 = sadd.s32 1, %s3427_s23  ;;  %s3435_s25 = sphi %s3493_s25, %s22_s25   ;;  %s3431_s24 = sphi %s3491_s24, %s4236_s24   ;;  %s3427_s23 = sphi %s3489_s23, %s4244_s23   ;;  %s3423_s22 = sphi %s3487_s22, %s4234_s22   ;;  %s3419_s21 = sphi %s3485_s21, %s4243_s21   ;;  %s3415_s20 = sphi %s3483_s20, %s4232_s20   ;;  %s3411_s19 = sphi %s3481_s19, %s4242_s19   ;;  %s3407_s18 = sphi %s3479_s18, %s4241_s18   ;;  %s3403_s17 = sphi %s3477_s17, %s4230_s17   ;;  %s3399_s16 = sphi %s3475_s16, %s4240_s16   ;;  %s3395_s15 = sphi %s3473_s15, %s4239_s15   ;;  %s3391_s14 = sphi %s3471_s14, %s4228_s14   ;;  %s3387_s13 = sphi %s3469_s13, %s4238_s13   ;;  %s3383_s12 = sphi %s3467_s12, %s4237_s12  }
  0x10   : > { %4186 = sst [smem:[#allocation14_spill]] %s3403_s17  ;;  %p4168_p0 = scmp.eq.s32.totalorder %s3435_s25, 0 }
  0x11   : > { %4187 = sst [smem:[#allocation15_spill]] %s3415_s20  ;;  %p3541_p1 = scmp.ge.s32.totalorder %s37_s26, 3 }
  0x12   : > { %4188 = sst [smem:[#allocation16_spill]] %s3419_s21  ;;  %p85_p2 = scmp.ne.s32.totalorder %s3403_s17, %s3399_s16 }
  0x13   : > { %4189 = sst [smem:[#allocation17_spill]] %s3423_s22  ;;  %p4167_p4 = scmp.lt.s32.totalorder %s3435_s25, 6 }
  0x14   : > { %4190 = sst [smem:[#allocation18_spill]] %s3427_s23  ;;  %p87_p5 = por %p85_p2, %p4168_p0 }
  0x15   : > { %4191 = sst [smem:[#allocation19_spill]] %s3431_s24  ;;  %s193_s29 = sand.u32 1, %s3435_s25  }
  0x16   : > { %s4166_s30 = sand.u32 1, %s3403_s17   ;;  %s2810_s5 = sshll.u32 %s3427_s23, 7 }
  0x17   : > { %s2630_s4 = sshll.u32 %s4166_s30, 8  ;;  %s4193_s1 = sld [smem:[#allocation25_spill]] }
  0x18   : > { %s197_s9 = scalar_lea.vmem [#allocation6], %s2630_s4  ;;  %p3565_p6 = pnand %p4167_p4, %p87_p5 }
  0x19   : > { %s207_s10 = sshll.u32 %s197_s9, 4  ;;  %s3572_s30 = scalar_lea.sflag [#allocation7], %s193_s29  ;;  %s3569_s10 = int_to_ptr.vmem [resolvable:$true] %s207_s10 }
  0x1a   : > { %p4179_p9 = pneg %p3565_p6 }
  0x1d   : > { %s3561_s8 = scalar_lea.hbm %s4193_s1, %s2810_s5  ;;  %s3200_s7 = scalar_lea.hbm %s4193_s1, 12288 }
  0x1e   : > { %s3195_s5 = scalar_lea.hbm %s3561_s8, 4096  ;;  %p3201_p12 = scmp.lt.u32.totalorder %s3561_s8, %s4193_s1 }
  0x1f   : > { %p3196_p8 = scmp.ne.s32.totalorder %s3561_s8, %s3195_s5  ;;  %p3202_p13 = scmp.lt.u32.totalorder %s3200_s7, %s3195_s5 }
  0x20   : > { %p3204_p5 = scmp.lt.u32.totalorder %s3195_s5, %s3561_s8 }
  0x21   : > { %p3198_p10 = pnand %p4179_p9, %p3196_p8  ;;  %p3203_p2 = por %p3202_p13, %p3201_p12 }
  0x23   : > { %p3199_p11 = pneg %p3198_p10  ;;  %p3205_p4 = por %p3204_p5, %p3203_p2 }
  0x25   : > { %p3206_p3 = pnand %p3205_p4, %p3199_p11 }
  0x27   : > { %3209 = shalt.err (!%p3206_p3)
}
  0x28   : > { %s3210_s29 = scalar_lea.vmem %s3569_s10, 4096  ;;  %s3437_s4 = smov [#allocation6]  }
  0x29   : > { %p3211_p8 = scmp.ne.s32.totalorder %s3569_s10, %s3210_s29  ;;  %s3215_s6 = sshll.u32 %s3437_s4, 4  ;;  %s3216_s6 = int_to_ptr.vmem [resolvable:$false] %s3215_s6 }
  0x2a   : > { %s3217_s28 = scalar_lea.vmem %s3216_s6, 8192  ;;  %p3218_p7 = scmp.lt.s32.totalorder %s3569_s10, %s3216_s6 }
  0x2b   : > { %p3213_p10 = pnand %p3211_p8, %p4179_p9  ;;  %p3219_p12 = scmp.lt.s32.totalorder %s3217_s28, %s3210_s29 }
  0x2d   : > { %p3214_p0 = pneg %p3213_p10  ;;  %p3220_p13 = por %p3219_p12, %p3218_p7 }
  0x2f   : > { %p3221_p2 = pnand %p3220_p13, %p3214_p0 }
  0x31   : > { %3224 = shalt.err (!%p3221_p2)
}
  0x32   : > { %s3438_s5 = smov 384   ;;  %s4169_s7 = smov 128  }
  0x33   : > { %s4170_s9 = smov 8   ;;  %p234_p0 = scmp.lt.s32.totalorder %s3435_s25, 7 }
  0x34   : > { %2923 = dma.hbm_to_vmem [thread:$0]  (!%p3565_p6), %s3561_s8, 4096, %s3569_s10, %s3572_s30, %s3438_s5, %s4169_s7, %s4170_s9  }
  0x35   : > { %p4195_p3 = scmp.ge.s32.totalorder %s3435_s25, 1  ;;  %s3610_s4 = sadd.s32 4294967295, %s3435_s25  }
  0x36   : > { %s2623_s6 = sadd.s32 4294967294, %s3435_s25   ;;  %s4246_s26 = smov (%p3541_p1, %s37_s26), 0 }
  0x37   : > { %p3605_p4 = pnand %p4195_p3, %p234_p0  ;;  %4197 = sst [smem:[#allocation20_spill]] %s4246_s26 }
  0x38   : > { %s41_s28 = sadd.s32 1, %s3431_s24  ;;  %s50_s8 = sadd.s32 1, %s3415_s20 }
  0x39   : > { %s4196_s29 = scalar_select %p3605_p4, 1, 0 }
  0x3a   : > { %s4248_s28 = smov (!%p3541_p1, %s41_s28), %s3431_s24  ;;  %p57_p7 = scmp.ne.s32.totalorder %s3415_s20, %s3411_s19 }
  0x3b   : > { %p63_p11 = scmp.ne.s32.totalorder %s3411_s19, %s3407_s18  ;;  %p43_p5 = scmp.ge.s32.totalorder %s4248_s28, 2 }
  0x3c   : > { %p64_p8 = scmp.eq.s32.totalorder %s3610_s4, 0  ;;  %p4198_p10 = scmp.eq.s32.totalorder %s3435_s25, 0 }
  0x3d   : > { %s74_s5 = ssub.s32 %s3427_s23, %s4246_s26  ;;  %s4250_s28 = smov (%p43_p5, %s4248_s28), 0 }
  0x3e   : > { %p3631_p12 = por %p4198_p10, %p57_p7  ;;  %4200 = sst [smem:[#allocation21_spill]] %s4250_s28 }
  0x3f   : > { %p3639_p1 = por %p64_p8, %p63_p11  ;;  %p76_p13 = scmp.eq.s32.totalorder %s74_s5, 0 }
  0x40   : > { %s45_s18 = ssub.s32 %s3431_s24, %s4250_s28  ;;  %p4202_p2 = scmp.ne.s32.totalorder %s3399_s16, %s3395_s15 }
  0x41   : > { %s4201_s27 = scalar_select %p3639_p1, 1, 0 }
  0x42   : > { %p3648_p0 = por %p4202_p2, %p64_p8  ;;  %p48_p3 = scmp.eq.s32.totalorder %s45_s18, 0 }
  0x43   : > { %s129_s9 = sor.u32 %s74_s5, %s45_s18  ;;  %s4204_s1 = sadd.s32 1, %s3403_s17 }
  0x44   : > { %s4203_s7 = scalar_select %p3648_p0, 1, 0 }
  0x45   : > { %s3655_s26 = scalar_select %p76_p13, %s3403_s17, %s4204_s1  }
  0x46   : > { %s3658_s3 = scalar_select %p48_p3, %s3415_s20, %s50_s8  }
  0x47   : > { %4205 = sst [smem:[#allocation22_spill]] %s3655_s26  ;;  %p130_p7 = scmp.eq.s32.totalorder %s129_s9, 0 }
  0x48   : > { %4206 = sst [smem:[#allocation23_spill]] %s3658_s3  ;;  %s132_s21 = sadd.s32 1, %s3391_s14 }
  0x49   : > { %p142_p11 = scmp.ne.s32.totalorder %s3391_s14, %s3387_s13  ;;  %p143_p5 = scmp.eq.s32.totalorder %s3610_s4, 5 }
  0x4a   : > { %s3665_s15 = scalar_select %p130_p7, %s3391_s14, %s132_s21  }
  0x4b   : > { %p3667_p8 = por %p143_p5, %p142_p11  ;;  %p148_p10 = scmp.ne.s32.totalorder %s3387_s13, %s3383_s12 }
  0x4c   : > { %4207 = sst [smem:[#allocation24_spill]] %s3665_s15  ;;  %p149_p2 = scmp.eq.s32.totalorder %s2623_s6, 5 }
  0x4d   : > { %s4208_s28 = scalar_select %p3667_p8, 1, 0 }
  0x4e   : > { %s169_s1 = sand.u32 1, %s3415_s20   ;;  %p3674_p13 = por %p149_p2, %p148_p10 }
  0x4f   : > { %s2626_s5 = sshll.u32 %s169_s1, 9  ;;  %s2809_s9 = sshll.u32 %s3431_s24, 13 }
  0x50   : > { %s4209_s8 = scalar_select %p3674_p13, 1, 0 }
  0x51   : > { %s173_s18 = scalar_lea.vmem [#allocation3], %s2626_s5  ;;  %s3682_s21 = scalar_lea.hbm %s4162_s0, %s2809_s9 }
  0x52   : > { %s183_s3 = sshll.u32 %s173_s18, 4  ;;  %p4210_p3 = scmp.lt.s32.totalorder %s3435_s25, 6  ;;  %s3684_s3 = int_to_ptr.vmem [resolvable:$true] %s183_s3 }
  0x53   : > { %s4212_s24 = sand.u32 1, %s3403_s17   ;;  %s2811_s22 = sshll.u32 %s3427_s23, 5 }
  0x54   : > { %p3690_p7 = pnand %p4210_p3, %p3631_p12  ;;  %s3696_s5 = sshll.u32 %s4212_s24, 1 }
  0x55   : > { %s3702_s18 = scalar_lea.hbm %s4164_s2, %s2811_s22  ;;  %s3704_s20 = scalar_lea.sflag [#allocation4], %s169_s1 }
  0x56   : > { %s3225_s15 = scalar_lea.hbm %s3682_s21, 8192  ;;  %p3227_p12 = pneg %p3690_p7 }
  0x57   : > { %p3226_p11 = scmp.ne.s32.totalorder %s3682_s21, %s3225_s15  ;;  %s3230_s24 = scalar_lea.hbm %s4162_s0, 16384 }
  0x58   : > { %p3231_p2 = scmp.lt.u32.totalorder %s3682_s21, %s4162_s0  ;;  %p3232_p3 = scmp.lt.u32.totalorder %s3230_s24, %s3225_s15 }
  0x59   : > { %p3228_p5 = pnand %p3227_p12, %p3226_p11  ;;  %p3234_p13 = scmp.lt.u32.totalorder %s3225_s15, %s3682_s21 }
  0x5a   : > { %p3233_p9 = por %p3232_p3, %p3231_p2 }
  0x5b   : > { %p3229_p10 = pneg %p3228_p5 }
  0x5c   : > { %p3235_p8 = por %p3234_p13, %p3233_p9 }
  0x5e   : > { %p3236_p0 = pnand %p3235_p8, %p3229_p10 }
  0x60   : > { %3239 = shalt.err (!%p3236_p0)
}
  0x61   : > { %s3240_s1 = scalar_lea.vmem %s3684_s3, 8192  ;;  %s3441_s17 = smov [#allocation3]  }
  0x62   : > { %p3241_p11 = scmp.ne.s32.totalorder %s3684_s3, %s3240_s1  ;;  %s3245_s22 = sshll.u32 %s3441_s17, 4  ;;  %s3246_s22 = int_to_ptr.vmem [resolvable:$false] %s3245_s22 }
  0x63   : > { %s3247_s14 = scalar_lea.vmem %s3246_s22, 16384  ;;  %p3248_p4 = scmp.lt.s32.totalorder %s3684_s3, %s3246_s22 }
  0x64   : > { %p3243_p5 = pnand %p3241_p11, %p3227_p12  ;;  %p3249_p2 = scmp.lt.s32.totalorder %s3247_s14, %s3240_s1 }
  0x66   : > { %p3244_p1 = pneg %p3243_p5  ;;  %p3250_p3 = por %p3249_p2, %p3248_p4 }
  0x68   : > { %p3251_p9 = pnand %p3250_p3, %p3244_p1 }
  0x6a   : > { %3254 = shalt.err (!%p3251_p9)
}
  0x6b   : > { %s4213_s23 = smov 8   ;;  %s4214_s15 = smov 128  }
  0x6c   : > { %2920 = dma.hbm_to_vmem [thread:$0]  (!%p3690_p7), %s3682_s21, 8192, %s3684_s3, %s3704_s20, %s4214_s15, %s4214_s15, %s4213_s23  }
  0x6d   : > { %s221_s26 = scalar_lea.vmem [#allocation8], %s3696_s5  ;;  %s3255_s10 = scalar_lea.hbm %s3702_s18, 32 }
  0x6e   : > { %s229_s9 = sshll.u32 %s221_s26, 4  ;;  %p3256_p4 = scmp.ne.s32.totalorder %s3702_s18, %s3255_s10  ;;  %s230_s9 = int_to_ptr.vmem [resolvable:$true] %s229_s9 }
  0x6f   : > { %p4215_p1 = pneg %p3565_p6  ;;  %s3260_s1 = scalar_lea.hbm %s4164_s2, 96 }
  0x70   : > { %p3261_p13 = scmp.lt.u32.totalorder %s3702_s18, %s4164_s2  ;;  %p3262_p12 = scmp.lt.u32.totalorder %s3260_s1, %s3255_s10 }
  0x71   : > { %p3258_p0 = pnand %p3256_p4, %p4215_p1  ;;  %p3264_p7 = scmp.lt.u32.totalorder %s3255_s10, %s3702_s18 }
  0x72   : > { %p3263_p10 = por %p3262_p12, %p3261_p13 }
  0x73   : > { %p3259_p8 = pneg %p3258_p0 }
  0x74   : > { %p3265_p11 = por %p3264_p7, %p3263_p10 }
  0x76   : > { %p3266_p5 = pnand %p3265_p11, %p3259_p8 }
  0x78   : > { %3269 = shalt.err (!%p3266_p5)
}
  0x79   : > { %s3270_s3 = scalar_lea.vmem %s230_s9, 32  ;;  %p4216_p3 = pmov %p4215_p1 }
  0x7a   : > { %p3271_p2 = scmp.ne.s32.totalorder %s230_s9, %s3270_s3  ;;  %s3442_s20 = smov [#allocation8]  }
  0x7b   : > { %s3275_s21 = sshll.u32 %s3442_s20, 4  ;;  %s3276_s21 = int_to_ptr.vmem [resolvable:$false] %s3275_s21 }
  0x7c   : > { %p3273_p9 = pnand %p3271_p2, %p4216_p3  ;;  %s3277_s5 = scalar_lea.vmem %s3276_s21, 64 }
  0x7d   : > { %p3278_p1 = scmp.lt.s32.totalorder %s230_s9, %s3276_s21  ;;  %p3279_p0 = scmp.lt.s32.totalorder %s3277_s5, %s3270_s3 }
  0x7e   : > { %p3274_p4 = pneg %p3273_p9 }
  0x7f   : > { %p3280_p12 = por %p3279_p0, %p3278_p1 }
  0x81   : > { %p3281_p13 = pnand %p3280_p12, %p3274_p4 }
  0x83   : > { %3284 = shalt.err (!%p3281_p13)
}
  0x84   : > { %2926 = dma.hbm_to_vmem [thread:$0]  (!%p3565_p6), %s3702_s18, 32, %s230_s9, %s3572_s30  }
  0x85   : > { %p4217_p8 = scmp.ne.s32.totalorder %s4196_s29, 0 }
  0x86   : > { %s240_s14 = sand.u32 (!%p4217_p8), 1, %s3411_s19   ;;  %p4218_p10 = scmp.ne.s32.totalorder (!%p4217_p8), %s4201_s27, 0 }
  0x87   : > { %238 = sbr.rel (%p4217_p8) target bundleno = 568 (0x238), region = 32  ;;  %s2637_s23 = sshll.u32 (!%p4217_p8), %s240_s14, 9 }
  0x88   : > { %s241_s15 = scalar_lea.sflag (!%p4217_p8), [#allocation4], %s240_s14  ;;  %s3759_s26 = scalar_lea.vmem (!%p4217_p8), [#allocation3], %s2637_s23 }
  0x8e   : > { %3370 = dma.done.wait (%p4218_p10), %s241_s15, 8192  }
  0x8f   : > { %3372 = vsyncadd (%p4218_p10), %s241_s15, 4294959104  ;;  %s249_s30 = sand.u32 1, %s3610_s4   ;;  %s251_s11 = sand.u32 1, %s3399_s16  }
  0x90   : > { %s2638_s29 = sshll.u32 %s251_s11, 8  ;;  %s250_s18 = scalar_lea.sflag [#allocation7], %s249_s30 }
  0x91   : > { %s3769_s9 = scalar_lea.vmem [#allocation6], %s2638_s29  ;;  %p4219_p6 = scmp.ne.s32.totalorder %s4203_s7, 0 }
  0x93   : > { %3374 = dma.done.wait (%p4219_p6), %s250_s18, 4128  }
  0x94   : > { %3376 = vsyncadd (%p4219_p6), %s250_s18, 4294963168  ;;  %v3051_v0 = vld [vmem:[%s3769_s9 + $0x4] ss:$8 sps:$4 sm:$0xff]   ;;  %v3053_v1 = vld [vmem:[%s3769_s9] ss:$8 sps:$4 sm:$0xff]   ;;  %s2639_s7 = sshll.u32 %s251_s11, 1 }
  0x95   : > { %1138 = vmatprep.subr.bf16.mxu0 %v3051_v0  ;;  %2876 = vmatprep.subr.bf16.mxu1 %v3051_v0  ;;  %v3054_v2 = vld [vmem:[%s3769_s9 + $0x14] ss:$8 sps:$4 sm:$0xff]   ;;  %v3056_v3 = vld [vmem:[%s3769_s9 + $0x10] ss:$8 sps:$4 sm:$0xff]   ;;  %v3057_v4 = vld [vmem:[%s3769_s9 + $0x24] ss:$8 sps:$4 sm:$0xff]  }
  0x96   : > { %1139 = vmatpush1.bf16.msra.mxu0 %v3053_v1  ;;  %2892 = vmatpush1.bf16.msra.mxu1 %v3053_v1  ;;  %v3059_v5 = vld [vmem:[%s3769_s9 + $0x20] ss:$8 sps:$4 sm:$0xff]   ;;  %v3060_v6 = vld [vmem:[%s3769_s9 + $0x34] ss:$8 sps:$4 sm:$0xff]   ;;  %v3062_v7 = vld [vmem:[%s3769_s9 + $0x30] ss:$8 sps:$4 sm:$0xff]  }
  0x97   : > { %1140 = vmatprep.subr.bf16.mxu0 %v3054_v2  ;;  %2877 = vmatprep.subr.bf16.mxu1 %v3054_v2  ;;  %v3063_v8 = vld [vmem:[%s3769_s9 + $0x44] ss:$8 sps:$4 sm:$0xff]   ;;  %v3065_v9 = vld [vmem:[%s3769_s9 + $0x40] ss:$8 sps:$4 sm:$0xff]   ;;  %v3066_v10 = vld [vmem:[%s3769_s9 + $0x54] ss:$8 sps:$4 sm:$0xff]  }
  0x98   : > { %v3068_v11 = vld [vmem:[%s3769_s9 + $0x50] ss:$8 sps:$4 sm:$0xff]   ;;  %v3069_v12 = vld [vmem:[%s3769_s9 + $0x64] ss:$8 sps:$4 sm:$0xff]   ;;  %v3071_v14 = vld [vmem:[%s3769_s9 + $0x60] ss:$8 sps:$4 sm:$0xff]  }
  0x99   : > { %v3101_v13 = vld [vmem:[%s3759_s26 + $0x4] ss:$8 sps:$4 sm:$0xff]   ;;  %v3072_v16 = vld [vmem:[%s3769_s9 + $0x74] ss:$8 sps:$4 sm:$0xff]   ;;  %v3074_v17 = vld [vmem:[%s3769_s9 + $0x70] ss:$8 sps:$4 sm:$0xff]  }
  0x9a   : > { %1141 = vmatpush1.bf16.msra.mxu0 %v3056_v3  ;;  %2893 = vmatpush1.bf16.msra.mxu1 %v3056_v3  ;;  %v3104_v15 = vld [vmem:[%s3759_s26 + $0x104] ss:$8 sps:$4 sm:$0xff]   ;;  %v3077_v19 = vld [vmem:[%s3769_s9 + $0x80] ss:$8 sps:$4 sm:$0xff]   ;;  %v3078_v20 = vld [vmem:[%s3769_s9 + $0x94] ss:$8 sps:$4 sm:$0xff]  }
  0x9b   : > { %1142 = vmatprep.subr.bf16.mxu0 %v3057_v4  ;;  %2878 = vmatprep.subr.bf16.mxu1 %v3057_v4  ;;  %v3075_v18 = vld [vmem:[%s3769_s9 + $0x84] ss:$8 sps:$4 sm:$0xff]   ;;  %v3080_v21 = vld [vmem:[%s3769_s9 + $0x90] ss:$8 sps:$4 sm:$0xff]   ;;  %v3083_v23 = vld [vmem:[%s3769_s9 + $0xa0] ss:$8 sps:$4 sm:$0xff]  }
  0x9c   : > { %1170 = vmatprep.mubr.bf16.mxu0 %v3101_v13  ;;  %1330 = vmatprep.mubr.bf16.mxu1 %v3104_v15  ;;  %v3081_v22 = vld [vmem:[%s3769_s9 + $0xa4] ss:$8 sps:$4 sm:$0xff]   ;;  %v3084_v24 = vld [vmem:[%s3769_s9 + $0xb4] ss:$8 sps:$4 sm:$0xff]   ;;  %v3086_v25 = vld [vmem:[%s3769_s9 + $0xb0] ss:$8 sps:$4 sm:$0xff]  }
  0x9d   : > { %v3087_v26 = vld [vmem:[%s3769_s9 + $0xc4] ss:$8 sps:$4 sm:$0xff]   ;;  %v3089_v27 = vld [vmem:[%s3769_s9 + $0xc0] ss:$8 sps:$4 sm:$0xff]   ;;  %v3090_v28 = vld [vmem:[%s3769_s9 + $0xd4] ss:$8 sps:$4 sm:$0xff]  }
  0x9e   : > { %1143 = vmatpush1.bf16.msra.mxu0 %v3059_v5  ;;  %2894 = vmatpush1.bf16.msra.mxu1 %v3059_v5  ;;  %v3092_v29 = vld [vmem:[%s3769_s9 + $0xd0] ss:$8 sps:$4 sm:$0xff]   ;;  %v3093_v30 = vld [vmem:[%s3769_s9 + $0xe4] ss:$8 sps:$4 sm:$0xff]   ;;  %v3095_v31 = vld [vmem:[%s3769_s9 + $0xe0] ss:$8 sps:$4 sm:$0xff]  }
  0x9f   : > { %1144 = vmatprep.subr.bf16.mxu0 %v3060_v6  ;;  %2879 = vmatprep.subr.bf16.mxu1 %v3060_v6  ;;  %v3096_v32 = vld [vmem:[%s3769_s9 + $0xf4] ss:$8 sps:$4 sm:$0xff]   ;;  %v3098_v33 = vld [vmem:[%s3769_s9 + $0xf0] ss:$8 sps:$4 sm:$0xff]   ;;  %v3099_v34 = vld [vmem:[%s3759_s26] ss:$8 sps:$4 sm:$0xff]  }
  0xa0   : > { %v3102_v35 = vld [vmem:[%s3759_s26 + $0x100] ss:$8 sps:$4 sm:$0xff]   ;;  %v3105_v36 = vld [vmem:[%s3759_s26 + $0x14] ss:$8 sps:$4 sm:$0xff]   ;;  %v3109_v38 = vld [vmem:[%s3759_s26 + $0x10] ss:$8 sps:$4 sm:$0xff]  }
  0xa1   : > { %v3107_v37 = vld [vmem:[%s3759_s26 + $0x114] ss:$8 sps:$4 sm:$0xff]   ;;  %v3110_v39 = vld [vmem:[%s3759_s26 + $0x110] ss:$8 sps:$4 sm:$0xff]   ;;  %v3111_v40 = vld [vmem:[%s3759_s26 + $0x24] ss:$8 sps:$4 sm:$0xff]  }
  0xa2   : > { %1145 = vmatpush1.bf16.msra.mxu0 %v3062_v7  ;;  %2895 = vmatpush1.bf16.msra.mxu1 %v3062_v7  ;;  %v3113_v41 = vld [vmem:[%s3759_s26 + $0x124] ss:$8 sps:$4 sm:$0xff]   ;;  %v3115_v42 = vld [vmem:[%s3759_s26 + $0x20] ss:$8 sps:$4 sm:$0xff]   ;;  %v3117_v44 = vld [vmem:[%s3759_s26 + $0x34] ss:$8 sps:$4 sm:$0xff]  }
  0xa3   : > { %1146 = vmatprep.subr.bf16.mxu0 %v3063_v8  ;;  %2880 = vmatprep.subr.bf16.mxu1 %v3063_v8  ;;  %v3116_v43 = vld [vmem:[%s3759_s26 + $0x120] ss:$8 sps:$4 sm:$0xff]   ;;  %v3119_v45 = vld [vmem:[%s3759_s26 + $0x134] ss:$8 sps:$4 sm:$0xff]   ;;  %v3121_v46 = vld [vmem:[%s3759_s26 + $0x30] ss:$8 sps:$4 sm:$0xff]  }
  0xa4   : > { %v3122_v47 = vld [vmem:[%s3759_s26 + $0x130] ss:$8 sps:$4 sm:$0xff]   ;;  %v3123_v48 = vld [vmem:[%s3759_s26 + $0x44] ss:$8 sps:$4 sm:$0xff]   ;;  %v3127_v50 = vld [vmem:[%s3759_s26 + $0x40] ss:$8 sps:$4 sm:$0xff]  }
  0xa5   : > { %v3125_v49 = vld [vmem:[%s3759_s26 + $0x144] ss:$8 sps:$4 sm:$0xff]   ;;  %v3128_v51 = vld [vmem:[%s3759_s26 + $0x140] ss:$8 sps:$4 sm:$0xff]   ;;  %v3129_v52 = vld [vmem:[%s3759_s26 + $0x54] ss:$8 sps:$4 sm:$0xff]  }
  0xa6   : > { %1147 = vmatpush1.bf16.msra.mxu0 %v3065_v9  ;;  %2896 = vmatpush1.bf16.msra.mxu1 %v3065_v9  ;;  %v3131_v53 = vld [vmem:[%s3759_s26 + $0x154] ss:$8 sps:$4 sm:$0xff]   ;;  %v3133_v54 = vld [vmem:[%s3759_s26 + $0x50] ss:$8 sps:$4 sm:$0xff]   ;;  %v3135_v56 = vld [vmem:[%s3759_s26 + $0x64] ss:$8 sps:$4 sm:$0xff]  }
  0xa7   : > { %1148 = vmatprep.subr.bf16.mxu0 %v3066_v10  ;;  %2881 = vmatprep.subr.bf16.mxu1 %v3066_v10  ;;  %v3134_v55 = vld [vmem:[%s3759_s26 + $0x150] ss:$8 sps:$4 sm:$0xff]   ;;  %v3137_v57 = vld [vmem:[%s3759_s26 + $0x164] ss:$8 sps:$4 sm:$0xff]   ;;  %v3139_v58 = vld [vmem:[%s3759_s26 + $0x60] ss:$8 sps:$4 sm:$0xff]  }
  0xa8   : > { %v3140_v59 = vld [vmem:[%s3759_s26 + $0x160] ss:$8 sps:$4 sm:$0xff]   ;;  %v3141_v60 = vld [vmem:[%s3759_s26 + $0x74] ss:$8 sps:$4 sm:$0xff]   ;;  %v3145_v62 = vld [vmem:[%s3759_s26 + $0x70] ss:$8 sps:$4 sm:$0xff]  }
  0xa9   : > { %v3143_v61 = vld [vmem:[%s3759_s26 + $0x174] ss:$8 sps:$4 sm:$0xff]   ;;  %v3146_v63 = vld [vmem:[%s3759_s26 + $0x170] ss:$8 sps:$4 sm:$0xff]   ;;  %v3147_v0 = vld [vmem:[%s3759_s26 + $0x84] ss:$8 sps:$4 sm:$0xff]  }
  0xaa   : > { %1149 = vmatpush1.bf16.msra.mxu0 %v3068_v11  ;;  %2897 = vmatpush1.bf16.msra.mxu1 %v3068_v11  ;;  %v3149_v1 = vld [vmem:[%s3759_s26 + $0x184] ss:$8 sps:$4 sm:$0xff]   ;;  %v3151_v2 = vld [vmem:[%s3759_s26 + $0x80] ss:$8 sps:$4 sm:$0xff]   ;;  %v3153_v4 = vld [vmem:[%s3759_s26 + $0x94] ss:$8 sps:$4 sm:$0xff]  }
  0xab   : > { %1150 = vmatprep.subr.bf16.mxu0 %v3069_v12  ;;  %2882 = vmatprep.subr.bf16.mxu1 %v3069_v12  ;;  %v3152_v3 = vld [vmem:[%s3759_s26 + $0x180] ss:$8 sps:$4 sm:$0xff]   ;;  %v3155_v5 = vld [vmem:[%s3759_s26 + $0x194] ss:$8 sps:$4 sm:$0xff]   ;;  %v3157_v6 = vld [vmem:[%s3759_s26 + $0x90] ss:$8 sps:$4 sm:$0xff]  }
  0xac   : > { %v3158_v7 = vld [vmem:[%s3759_s26 + $0x190] ss:$8 sps:$4 sm:$0xff]   ;;  %v3159_v8 = vld [vmem:[%s3759_s26 + $0xa4] ss:$8 sps:$4 sm:$0xff]   ;;  %v3163_v10 = vld [vmem:[%s3759_s26 + $0xa0] ss:$8 sps:$4 sm:$0xff]  }
  0xad   : > { %v3161_v9 = vld [vmem:[%s3759_s26 + $0x1a4] ss:$8 sps:$4 sm:$0xff]   ;;  %v3164_v11 = vld [vmem:[%s3759_s26 + $0x1a0] ss:$8 sps:$4 sm:$0xff]   ;;  %v3165_v12 = vld [vmem:[%s3759_s26 + $0xb4] ss:$8 sps:$4 sm:$0xff]  }
  0xae   : > { %1151 = vmatpush1.bf16.msra.mxu0 %v3071_v14  ;;  %2898 = vmatpush1.bf16.msra.mxu1 %v3071_v14  ;;  %v3167_v13 = vld [vmem:[%s3759_s26 + $0x1b4] ss:$8 sps:$4 sm:$0xff]   ;;  %v3169_v14 = vld [vmem:[%s3759_s26 + $0xb0] ss:$8 sps:$4 sm:$0xff]   ;;  %s262_s4 = scalar_lea.vmem [#allocation8], %s2639_s7  ;;  %s292_s27 = sand.u32 1, %s3387_s13  }
  0xaf   : > { %1152 = vmatprep.subr.bf16.mxu0 %v3072_v16  ;;  %2883 = vmatprep.subr.bf16.mxu1 %v3072_v16  ;;  %v3170_v15 = vld [vmem:[%s3759_s26 + $0x1b0] ss:$8 sps:$4 sm:$0xff]   ;;  %v3171_v16 = vld [vmem:[%s3759_s26 + $0xc4] ss:$8 sps:$4 sm:$0xff]   ;;  %s2640_s10 = sshll.u32 %s292_s27, 9  ;;  %s4220_s24 = sld [smem:[#allocation17_spill]] }
  0xb0   : > { %s3888_s6 = scalar_lea.vmem [#allocation9], %s2640_s10  ;;  %s4221_s1 = sld [smem:[#allocation16_spill]] }
  0xb1   : > { %s2483_s21 = sshll.u32 %s3888_s6, 4  ;;  %s4222_s23 = sld [smem:[#allocation26_spill]]  ;;  %s4078_s21 = int_to_ptr.vmem [resolvable:$true] %s2483_s21 }
  0xb2   : > { %1153 = vmatpush1.bf16.msra.mxu0 %v3074_v17  ;;  %2899 = vmatpush1.bf16.msra.mxu1 %v3074_v17  ;;  %v3173_v17 = vld [vmem:[%s3759_s26 + $0x1c4] ss:$8 sps:$4 sm:$0xff]   ;;  %s4086_s30 = scalar_lea.sflag [#allocation5], %s292_s27  ;;  %s3285_s11 = scalar_lea.vmem %s4078_s21, 8192 }
  0xb3   : > { %1154 = vmatprep.subr.bf16.mxu0 %v3075_v18  ;;  %2884 = vmatprep.subr.bf16.mxu1 %v3075_v18  ;;  %v3175_v18 = vld [vmem:[%s3759_s26 + $0xc0] ss:$8 sps:$4 sm:$0xff]   ;;  %p3286_p7 = scmp.ne.s32.totalorder %s4078_s21, %s3285_s11  ;;  %p4224_p11 = scmp.ne.s32.totalorder %s4208_s28, 0 }
  0xb4   : > { %s3443_s29 = smov [#allocation9]  }
  0xb5   : > { %s2908_s17 = smul.u32 384, %s4220_s24  ;;  %p3287_p5 = pnand %p3286_p7, %p4224_p11 }
  0xb6   : > { %1155 = vmatpush1.bf16.msra.mxu0 %v3077_v19  ;;  %2900 = vmatpush1.bf16.msra.mxu1 %v3077_v19  ;;  %v3176_v19 = vld [vmem:[%s3759_s26 + $0x1c0] ss:$8 sps:$4 sm:$0xff]   ;;  %s2803_s22 = sshll.u32 %s4221_s1, 1  ;;  %s3289_s18 = sshll.u32 %s3443_s29, 4  ;;  %s3290_s18 = int_to_ptr.vmem [resolvable:$false] %s3289_s18 }
  0xb7   : > { %1156 = vmatprep.subr.bf16.mxu0 %v3078_v20  ;;  %2885 = vmatprep.subr.bf16.mxu1 %v3078_v20  ;;  %v3177_v20 = vld [vmem:[%s3759_s26 + $0xd4] ss:$8 sps:$4 sm:$0xff]   ;;  %s2480_s3 = sadd.s32 %s2908_s17, %s2803_s22  ;;  %p3288_p2 = pneg %p3287_p5 }
  0xb8   : > { %s2805_s20 = sshll.u32 %s2480_s3, 6  ;;  %s3291_s9 = scalar_lea.vmem %s3290_s18, 16384 }
  0xb9   : > { %s4076_s15 = scalar_lea.hbm %s4222_s23, %s2805_s20  ;;  %p3292_p3 = scmp.lt.s32.totalorder %s4078_s21, %s3290_s18 }
  0xba   : > { %1157 = vmatpush1.bf16.msra.mxu0 %v3080_v21  ;;  %2901 = vmatpush1.bf16.msra.mxu1 %v3080_v21  ;;  %v3179_v21 = vld [vmem:[%s3759_s26 + $0x1d4] ss:$8 sps:$4 sm:$0xff]   ;;  %p3293_p9 = scmp.lt.s32.totalorder %s3291_s9, %s3285_s11 }
  0xbb   : > { %1158 = vmatprep.subr.bf16.mxu0 %v3081_v22  ;;  %2886 = vmatprep.subr.bf16.mxu1 %v3081_v22  ;;  %v3181_v22 = vld [vmem:[%s3759_s26 + $0xd0] ss:$8 sps:$4 sm:$0xff]  }
  0xbc   : > { %p3294_p4 = por %p3293_p9, %p3292_p3 }
  0xbe   : > { %1159 = vmatpush1.bf16.msra.mxu0 %v3083_v23  ;;  %2902 = vmatpush1.bf16.msra.mxu1 %v3083_v23  ;;  %v3182_v23 = vld [vmem:[%s3759_s26 + $0x1d0] ss:$8 sps:$4 sm:$0xff]   ;;  %p3295_p1 = pnand %p3294_p4, %p3288_p2 }
  0xbf   : > { %1160 = vmatprep.subr.bf16.mxu0 %v3084_v24  ;;  %2887 = vmatprep.subr.bf16.mxu1 %v3084_v24  ;;  %v3183_v24 = vld [vmem:[%s3759_s26 + $0xe4] ss:$8 sps:$4 sm:$0xff]  }
  0xc2   : > { %1161 = vmatpush1.bf16.msra.mxu0 %v3086_v25  ;;  %2903 = vmatpush1.bf16.msra.mxu1 %v3086_v25  ;;  %v3185_v25 = vld [vmem:[%s3759_s26 + $0x1e4] ss:$8 sps:$4 sm:$0xff]  }
  0xc3   : > { %1162 = vmatprep.subr.bf16.mxu0 %v3087_v26  ;;  %2888 = vmatprep.subr.bf16.mxu1 %v3087_v26  ;;  %v3187_v26 = vld [vmem:[%s3759_s26 + $0xe0] ss:$8 sps:$4 sm:$0xff]  }
  0xc6   : > { %1163 = vmatpush1.bf16.msra.mxu0 %v3089_v27  ;;  %2904 = vmatpush1.bf16.msra.mxu1 %v3089_v27  ;;  %v3188_v27 = vld [vmem:[%s3759_s26 + $0x1e0] ss:$8 sps:$4 sm:$0xff]  }
  0xc7   : > { %1164 = vmatprep.subr.bf16.mxu0 %v3090_v28  ;;  %2889 = vmatprep.subr.bf16.mxu1 %v3090_v28  ;;  %v3189_v28 = vld [vmem:[%s3759_s26 + $0xf4] ss:$8 sps:$4 sm:$0xff]  }
  0xca   : > { %1165 = vmatpush1.bf16.msra.mxu0 %v3092_v29  ;;  %2905 = vmatpush1.bf16.msra.mxu1 %v3092_v29  ;;  %v3191_v29 = vld [vmem:[%s3759_s26 + $0x1f4] ss:$8 sps:$4 sm:$0xff]  }
  0xcb   : > { %1166 = vmatprep.subr.bf16.mxu0 %v3093_v30  ;;  %2890 = vmatprep.subr.bf16.mxu1 %v3093_v30  ;;  %v3193_v30 = vld [vmem:[%s3759_s26 + $0xf0] ss:$8 sps:$4 sm:$0xff]  }
  0xce   : > { %1167 = vmatpush1.bf16.msra.mxu0 %v3095_v31  ;;  %2906 = vmatpush1.bf16.msra.mxu1 %v3095_v31  ;;  %v3194_v31 = vld [vmem:[%s3759_s26 + $0x1f0] ss:$8 sps:$4 sm:$0xff]   ;;  %s4223_s26 = smov %s4222_s23 }
  0xcf   : > { %1168 = vmatprep.subr.bf16.mxu0 %v3096_v32  ;;  %2891 = vmatprep.subr.bf16.mxu1 %v3096_v32  ;;  %v1880_v32 = vlaneseq }
  0xd2   : > { %1169 = vmatpush1.bf16.msra.mxu0 %v3098_v33  ;;  %2907 = vmatpush1.bf16.msra.mxu1 %v3098_v33  ;;  %v1881_v33 = vshrl.u32 %v1880_v32, 7 }
  0xd5   : > { %1171 = vmatmul.mubr.bf16.vlgmr.msra.gmra.mrb[0].mxu0 %v3099_v34  ;;  %1331 = vmatmul.mubr.bf16.vlgmr.msra.gmra.mrb[0].mxu1 %v3102_v35  ;;  %v1882_v34 = vsub.s32 0, %v1881_v33  ;;  %v1878_v35 = vld [vmem:[%s262_s4] sm:$0x3] }
  0xd6   : > { %1180 = vmatprep.mubr.bf16.mxu0 %v3105_v36  ;;  %1340 = vmatprep.mubr.bf16.mxu1 %v3107_v37  ;;  %v1886_v36 = vsub.s32 1, %v1881_v33 }
  0xd7   : > { %v3873_v37 = vrot.slane %v1878_v35, %v1882_v34 }
  0xdd   : > { %1181 = vmatmul.mubr.bf16.gmra.mrb[4].mxu0 %v3109_v38  ;;  %1341 = vmatmul.mubr.bf16.gmra.mrb[4].mxu1 %v3110_v39  ;;  %v3876_v38 = vrot.slane %v1878_v35, %v1886_v36 }
  0xde   : > { %1190 = vmatprep.mubr.bf16.mxu0 %v3111_v40  ;;  %1350 = vmatprep.mubr.bf16.mxu1 %v3113_v41 }
  0xe5   : > { %1191 = vmatmul.mubr.bf16.gmra.mrb[8].mxu0 %v3115_v42  ;;  %1351 = vmatmul.mubr.bf16.gmra.mrb[8].mxu1 %v3116_v43 }
  0xe6   : > { %1200 = vmatprep.mubr.bf16.mxu0 %v3117_v44  ;;  %1360 = vmatprep.mubr.bf16.mxu1 %v3119_v45 }
  0xed   : > { %1201 = vmatmul.mubr.bf16.gmra.mrb[12].mxu0 %v3121_v46  ;;  %1361 = vmatmul.mubr.bf16.gmra.mrb[12].mxu1 %v3122_v47 }
  0xee   : > { %1210 = vmatprep.mubr.bf16.mxu0 %v3123_v48  ;;  %1370 = vmatprep.mubr.bf16.mxu1 %v3125_v49 }
  0xf5   : > { %1211 = vmatmul.mubr.bf16.gmra.mrb[16].mxu0 %v3127_v50  ;;  %1371 = vmatmul.mubr.bf16.gmra.mrb[16].mxu1 %v3128_v51 }
  0xf6   : > { %1220 = vmatprep.mubr.bf16.mxu0 %v3129_v52  ;;  %1380 = vmatprep.mubr.bf16.mxu1 %v3131_v53 }
  0xfd   : > { %1221 = vmatmul.mubr.bf16.gmra.mrb[20].mxu0 %v3133_v54  ;;  %1381 = vmatmul.mubr.bf16.gmra.mrb[20].mxu1 %v3134_v55 }
  0xfe   : > { %1230 = vmatprep.mubr.bf16.mxu0 %v3135_v56  ;;  %1390 = vmatprep.mubr.bf16.mxu1 %v3137_v57 }
 0x105   : > { %1231 = vmatmul.mubr.bf16.gmra.mrb[24].mxu0 %v3139_v58  ;;  %1391 = vmatmul.mubr.bf16.gmra.mrb[24].mxu1 %v3140_v59 }
 0x106   : > { %1240 = vmatprep.mubr.bf16.mxu0 %v3141_v60  ;;  %1400 = vmatprep.mubr.bf16.mxu1 %v3143_v61 }
 0x10d   : > { %1241 = vmatmul.mubr.bf16.gmra.mrb[28].mxu0 %v3145_v62  ;;  %1401 = vmatmul.mubr.bf16.gmra.mrb[28].mxu1 %v3146_v63 }
 0x10e   : > { %1250 = vmatprep.mubr.bf16.mxu0 %v3147_v0  ;;  %1410 = vmatprep.mubr.bf16.mxu1 %v3149_v1 }
 0x115   : > { %1251 = vmatmul.mubr.bf16.gmra.mrb[32].mxu0 %v3151_v2  ;;  %1411 = vmatmul.mubr.bf16.gmra.mrb[32].mxu1 %v3152_v3 }
 0x116   : > { %1260 = vmatprep.mubr.bf16.mxu0 %v3153_v4  ;;  %1420 = vmatprep.mubr.bf16.mxu1 %v3155_v5 }
 0x11d   : > { %1261 = vmatmul.mubr.bf16.gmra.mrb[36].mxu0 %v3157_v6  ;;  %1421 = vmatmul.mubr.bf16.gmra.mrb[36].mxu1 %v3158_v7 }
 0x11e   : > { %1270 = vmatprep.mubr.bf16.mxu0 %v3159_v8  ;;  %1430 = vmatprep.mubr.bf16.mxu1 %v3161_v9 }
 0x125   : > { %1271 = vmatmul.mubr.bf16.gmra.mrb[40].mxu0 %v3163_v10  ;;  %1431 = vmatmul.mubr.bf16.gmra.mrb[40].mxu1 %v3164_v11 }
 0x126   : > { %1280 = vmatprep.mubr.bf16.mxu0 %v3165_v12  ;;  %1440 = vmatprep.mubr.bf16.mxu1 %v3167_v13 }
 0x12d   : > { %1281 = vmatmul.mubr.bf16.gmra.mrb[44].mxu0 %v3169_v14  ;;  %1441 = vmatmul.mubr.bf16.gmra.mrb[44].mxu1 %v3170_v15 }
 0x12e   : > { %1290 = vmatprep.mubr.bf16.mxu0 %v3171_v16  ;;  %1450 = vmatprep.mubr.bf16.mxu1 %v3173_v17 }
 0x135   : > { %1291 = vmatmul.mubr.bf16.gmra.mrb[48].mxu0 %v3175_v18  ;;  %1451 = vmatmul.mubr.bf16.gmra.mrb[48].mxu1 %v3176_v19 }
 0x136   : > { %1300 = vmatprep.mubr.bf16.mxu0 %v3177_v20  ;;  %1460 = vmatprep.mubr.bf16.mxu1 %v3179_v21 }
 0x13d   : > { %1301 = vmatmul.mubr.bf16.gmra.mrb[52].mxu0 %v3181_v22  ;;  %1461 = vmatmul.mubr.bf16.gmra.mrb[52].mxu1 %v3182_v23 }
 0x13e   : > { %1310 = vmatprep.mubr.bf16.mxu0 %v3183_v24  ;;  %1470 = vmatprep.mubr.bf16.mxu1 %v3185_v25 }
 0x145   : > { %1311 = vmatmul.mubr.bf16.gmra.mrb[56].mxu0 %v3187_v26  ;;  %1471 = vmatmul.mubr.bf16.gmra.mrb[56].mxu1 %v3188_v27 }
 0x146   : > { %1320 = vmatprep.mubr.bf16.mxu0 %v3189_v28  ;;  %1480 = vmatprep.mubr.bf16.mxu1 %v3191_v29 }
 0x14d   : > { %1321 = vmatmul.mubr.bf16.gmra.mrb[60].mxu0 %v3193_v30  ;;  %1481 = vmatmul.mubr.bf16.gmra.mrb[60].mxu1 %v3194_v31 }
 0x1a8   : > { %v1172_v39 = vpop.f32.mrb[0].mxu0  ;;  %v1332_v40 = vpop.f32.mrb[0].mxu1 }
 0x1a9   : > { %v1890_v41 = vadd.f32 %v3873_v37, %v1172_v39  ;;  %v1954_v42 = vadd.f32 %v3873_v37, %v1332_v40  ;;  %v1174_v43 = vpop.f32.mrb[1].mxu0  ;;  %v1334_v44 = vpop.f32.mrb[1].mxu1 }
 0x1aa   : > { %v1891_v45 = vadd.f32 %v3876_v38, %v1174_v43  ;;  %v1955_v46 = vadd.f32 %v3876_v38, %v1334_v44  ;;  %v1176_v47 = vpop.f32.mrb[2].mxu0  ;;  %v1336_v48 = vpop.f32.mrb[2].mxu1 }
 0x1ab   : > { %v1892_v49 = vadd.f32 %v3873_v37, %v1176_v47  ;;  %v1956_v50 = vadd.f32 %v3873_v37, %v1336_v48  ;;  %v1178_v51 = vpop.f32.mrb[3].mxu0  ;;  %v1338_v52 = vpop.f32.mrb[3].mxu1 }
 0x1ac   : > { %v2812_v53 = vpack.c.bf16 %v1891_v45, %v1890_v41  ;;  %v2844_v54 = vpack.c.bf16 %v1955_v46, %v1954_v42  ;;  %v1893_v55 = vadd.f32 %v3876_v38, %v1178_v51  ;;  %v1957_v56 = vadd.f32 %v3876_v38, %v1338_v52 }
 0x1ae   : > { %2402 = vst [vmem:[%s3888_s6] sm:$0xff] %v2812_v53  ;;  %2434 = vst [vmem:[%s3888_s6 + $0x100] sm:$0xff] %v2844_v54  ;;  %v2813_v57 = vpack.c.bf16 %v1893_v55, %v1892_v49  ;;  %v2845_v58 = vpack.c.bf16 %v1957_v56, %v1956_v50 }
 0x1b0   : > { %2403 = vst [vmem:[%s3888_s6 + $0x8] sm:$0xff] %v2813_v57  ;;  %2435 = vst [vmem:[%s3888_s6 + $0x108] sm:$0xff] %v2845_v58  ;;  %v1182_v59 = vpop.f32.mrb[4].mxu0  ;;  %v1342_v60 = vpop.f32.mrb[4].mxu1 }
 0x1b1   : > { %v1894_v61 = vadd.f32 %v3873_v37, %v1182_v59  ;;  %v1958_v62 = vadd.f32 %v3873_v37, %v1342_v60  ;;  %v1184_v63 = vpop.f32.mrb[5].mxu0  ;;  %v1344_v0 = vpop.f32.mrb[5].mxu1 }
 0x1b2   : > { %v1895_v1 = vadd.f32 %v3876_v38, %v1184_v63  ;;  %v1959_v2 = vadd.f32 %v3876_v38, %v1344_v0  ;;  %v1186_v3 = vpop.f32.mrb[6].mxu0  ;;  %v1346_v4 = vpop.f32.mrb[6].mxu1 }
 0x1b3   : > { %v1896_v5 = vadd.f32 %v3873_v37, %v1186_v3  ;;  %v1960_v6 = vadd.f32 %v3873_v37, %v1346_v4  ;;  %v1188_v7 = vpop.f32.mrb[7].mxu0  ;;  %v1348_v8 = vpop.f32.mrb[7].mxu1 }
 0x1b4   : > { %v2814_v9 = vpack.c.bf16 %v1895_v1, %v1894_v61  ;;  %v2846_v10 = vpack.c.bf16 %v1959_v2, %v1958_v62  ;;  %v1897_v11 = vadd.f32 %v3876_v38, %v1188_v7  ;;  %v1961_v12 = vadd.f32 %v3876_v38, %v1348_v8 }
 0x1b6   : > { %2404 = vst [vmem:[%s3888_s6 + $0x10] sm:$0xff] %v2814_v9  ;;  %2436 = vst [vmem:[%s3888_s6 + $0x110] sm:$0xff] %v2846_v10  ;;  %v2815_v13 = vpack.c.bf16 %v1897_v11, %v1896_v5  ;;  %v2847_v14 = vpack.c.bf16 %v1961_v12, %v1960_v6 }
 0x1b8   : > { %2405 = vst [vmem:[%s3888_s6 + $0x18] sm:$0xff] %v2815_v13  ;;  %2437 = vst [vmem:[%s3888_s6 + $0x118] sm:$0xff] %v2847_v14  ;;  %v1192_v15 = vpop.f32.mrb[8].mxu0  ;;  %v1352_v16 = vpop.f32.mrb[8].mxu1 }
 0x1b9   : > { %v1898_v17 = vadd.f32 %v3873_v37, %v1192_v15  ;;  %v1962_v18 = vadd.f32 %v3873_v37, %v1352_v16  ;;  %v1194_v19 = vpop.f32.mrb[9].mxu0  ;;  %v1354_v20 = vpop.f32.mrb[9].mxu1 }
 0x1ba   : > { %v1899_v21 = vadd.f32 %v3876_v38, %v1194_v19  ;;  %v1963_v22 = vadd.f32 %v3876_v38, %v1354_v20  ;;  %v1196_v23 = vpop.f32.mrb[10].mxu0  ;;  %v1356_v24 = vpop.f32.mrb[10].mxu1 }
 0x1bb   : > { %v1900_v25 = vadd.f32 %v3873_v37, %v1196_v23  ;;  %v1964_v26 = vadd.f32 %v3873_v37, %v1356_v24  ;;  %v1198_v27 = vpop.f32.mrb[11].mxu0  ;;  %v1358_v28 = vpop.f32.mrb[11].mxu1 }
 0x1bc   : > { %v2816_v29 = vpack.c.bf16 %v1899_v21, %v1898_v17  ;;  %v2848_v30 = vpack.c.bf16 %v1963_v22, %v1962_v18  ;;  %v1901_v31 = vadd.f32 %v3876_v38, %v1198_v27  ;;  %v1965_v32 = vadd.f32 %v3876_v38, %v1358_v28 }
 0x1be   : > { %2406 = vst [vmem:[%s3888_s6 + $0x20] sm:$0xff] %v2816_v29  ;;  %2438 = vst [vmem:[%s3888_s6 + $0x120] sm:$0xff] %v2848_v30  ;;  %v2817_v33 = vpack.c.bf16 %v1901_v31, %v1900_v25  ;;  %v2849_v34 = vpack.c.bf16 %v1965_v32, %v1964_v26 }
 0x1c0   : > { %2407 = vst [vmem:[%s3888_s6 + $0x28] sm:$0xff] %v2817_v33  ;;  %2439 = vst [vmem:[%s3888_s6 + $0x128] sm:$0xff] %v2849_v34  ;;  %v1202_v35 = vpop.f32.mrb[12].mxu0  ;;  %v1362_v36 = vpop.f32.mrb[12].mxu1 }
 0x1c1   : > { %v1902_v39 = vadd.f32 %v3873_v37, %v1202_v35  ;;  %v1966_v40 = vadd.f32 %v3873_v37, %v1362_v36  ;;  %v1204_v41 = vpop.f32.mrb[13].mxu0  ;;  %v1364_v42 = vpop.f32.mrb[13].mxu1 }
 0x1c2   : > { %v1903_v43 = vadd.f32 %v3876_v38, %v1204_v41  ;;  %v1967_v44 = vadd.f32 %v3876_v38, %v1364_v42  ;;  %v1206_v45 = vpop.f32.mrb[14].mxu0  ;;  %v1366_v46 = vpop.f32.mrb[14].mxu1 }
 0x1c3   : > { %v1904_v47 = vadd.f32 %v3873_v37, %v1206_v45  ;;  %v1968_v48 = vadd.f32 %v3873_v37, %v1366_v46  ;;  %v1208_v49 = vpop.f32.mrb[15].mxu0  ;;  %v1368_v50 = vpop.f32.mrb[15].mxu1 }
 0x1c4   : > { %v2818_v51 = vpack.c.bf16 %v1903_v43, %v1902_v39  ;;  %v2850_v52 = vpack.c.bf16 %v1967_v44, %v1966_v40  ;;  %v1905_v53 = vadd.f32 %v3876_v38, %v1208_v49  ;;  %v1969_v54 = vadd.f32 %v3876_v38, %v1368_v50 }
 0x1c6   : > { %2408 = vst [vmem:[%s3888_s6 + $0x30] sm:$0xff] %v2818_v51  ;;  %2440 = vst [vmem:[%s3888_s6 + $0x130] sm:$0xff] %v2850_v52  ;;  %v2819_v55 = vpack.c.bf16 %v1905_v53, %v1904_v47  ;;  %v2851_v56 = vpack.c.bf16 %v1969_v54, %v1968_v48 }
 0x1c8   : > { %2409 = vst [vmem:[%s3888_s6 + $0x38] sm:$0xff] %v2819_v55  ;;  %2441 = vst [vmem:[%s3888_s6 + $0x138] sm:$0xff] %v2851_v56  ;;  %v1212_v57 = vpop.f32.mrb[16].mxu0  ;;  %v1372_v58 = vpop.f32.mrb[16].mxu1 }
 0x1c9   : > { %v1906_v59 = vadd.f32 %v3873_v37, %v1212_v57  ;;  %v1970_v60 = vadd.f32 %v3873_v37, %v1372_v58  ;;  %v1214_v61 = vpop.f32.mrb[17].mxu0  ;;  %v1374_v62 = vpop.f32.mrb[17].mxu1 }
 0x1ca   : > { %v1907_v63 = vadd.f32 %v3876_v38, %v1214_v61  ;;  %v1971_v0 = vadd.f32 %v3876_v38, %v1374_v62  ;;  %v1216_v1 = vpop.f32.mrb[18].mxu0  ;;  %v1376_v2 = vpop.f32.mrb[18].mxu1 }
 0x1cb   : > { %v1908_v3 = vadd.f32 %v3873_v37, %v1216_v1  ;;  %v1972_v4 = vadd.f32 %v3873_v37, %v1376_v2  ;;  %v1218_v5 = vpop.f32.mrb[19].mxu0  ;;  %v1378_v6 = vpop.f32.mrb[19].mxu1 }
 0x1cc   : > { %v2820_v7 = vpack.c.bf16 %v1907_v63, %v1906_v59  ;;  %v2852_v8 = vpack.c.bf16 %v1971_v0, %v1970_v60  ;;  %v1909_v9 = vadd.f32 %v3876_v38, %v1218_v5  ;;  %v1973_v10 = vadd.f32 %v3876_v38, %v1378_v6 }
 0x1ce   : > { %2410 = vst [vmem:[%s3888_s6 + $0x40] sm:$0xff] %v2820_v7  ;;  %2442 = vst [vmem:[%s3888_s6 + $0x140] sm:$0xff] %v2852_v8  ;;  %v2821_v11 = vpack.c.bf16 %v1909_v9, %v1908_v3  ;;  %v2853_v12 = vpack.c.bf16 %v1973_v10, %v1972_v4 }
 0x1d0   : > { %2411 = vst [vmem:[%s3888_s6 + $0x48] sm:$0xff] %v2821_v11  ;;  %2443 = vst [vmem:[%s3888_s6 + $0x148] sm:$0xff] %v2853_v12  ;;  %v1222_v13 = vpop.f32.mrb[20].mxu0  ;;  %v1382_v14 = vpop.f32.mrb[20].mxu1 }
 0x1d1   : > { %v1910_v15 = vadd.f32 %v3873_v37, %v1222_v13  ;;  %v1974_v16 = vadd.f32 %v3873_v37, %v1382_v14  ;;  %v1224_v17 = vpop.f32.mrb[21].mxu0  ;;  %v1384_v18 = vpop.f32.mrb[21].mxu1 }
 0x1d2   : > { %v1911_v19 = vadd.f32 %v3876_v38, %v1224_v17  ;;  %v1975_v20 = vadd.f32 %v3876_v38, %v1384_v18  ;;  %v1226_v21 = vpop.f32.mrb[22].mxu0  ;;  %v1386_v22 = vpop.f32.mrb[22].mxu1 }
 0x1d3   : > { %v1912_v23 = vadd.f32 %v3873_v37, %v1226_v21  ;;  %v1976_v24 = vadd.f32 %v3873_v37, %v1386_v22  ;;  %v1228_v25 = vpop.f32.mrb[23].mxu0  ;;  %v1388_v26 = vpop.f32.mrb[23].mxu1 }
 0x1d4   : > { %v2822_v27 = vpack.c.bf16 %v1911_v19, %v1910_v15  ;;  %v2854_v28 = vpack.c.bf16 %v1975_v20, %v1974_v16  ;;  %v1913_v29 = vadd.f32 %v3876_v38, %v1228_v25  ;;  %v1977_v30 = vadd.f32 %v3876_v38, %v1388_v26 }
 0x1d6   : > { %2412 = vst [vmem:[%s3888_s6 + $0x50] sm:$0xff] %v2822_v27  ;;  %2444 = vst [vmem:[%s3888_s6 + $0x150] sm:$0xff] %v2854_v28  ;;  %v2823_v31 = vpack.c.bf16 %v1913_v29, %v1912_v23  ;;  %v2855_v32 = vpack.c.bf16 %v1977_v30, %v1976_v24 }
 0x1d8   : > { %2413 = vst [vmem:[%s3888_s6 + $0x58] sm:$0xff] %v2823_v31  ;;  %2445 = vst [vmem:[%s3888_s6 + $0x158] sm:$0xff] %v2855_v32  ;;  %v1232_v33 = vpop.f32.mrb[24].mxu0  ;;  %v1392_v34 = vpop.f32.mrb[24].mxu1 }
 0x1d9   : > { %v1914_v35 = vadd.f32 %v3873_v37, %v1232_v33  ;;  %v1978_v36 = vadd.f32 %v3873_v37, %v1392_v34  ;;  %v1234_v39 = vpop.f32.mrb[25].mxu0  ;;  %v1394_v40 = vpop.f32.mrb[25].mxu1 }
 0x1da   : > { %v1915_v41 = vadd.f32 %v3876_v38, %v1234_v39  ;;  %v1979_v42 = vadd.f32 %v3876_v38, %v1394_v40  ;;  %v1236_v43 = vpop.f32.mrb[26].mxu0  ;;  %v1396_v44 = vpop.f32.mrb[26].mxu1 }
 0x1db   : > { %v1916_v45 = vadd.f32 %v3873_v37, %v1236_v43  ;;  %v1980_v46 = vadd.f32 %v3873_v37, %v1396_v44  ;;  %v1238_v47 = vpop.f32.mrb[27].mxu0  ;;  %v1398_v48 = vpop.f32.mrb[27].mxu1 }
 0x1dc   : > { %v2824_v49 = vpack.c.bf16 %v1915_v41, %v1914_v35  ;;  %v2856_v50 = vpack.c.bf16 %v1979_v42, %v1978_v36  ;;  %v1917_v51 = vadd.f32 %v3876_v38, %v1238_v47  ;;  %v1981_v52 = vadd.f32 %v3876_v38, %v1398_v48 }
 0x1de   : > { %2414 = vst [vmem:[%s3888_s6 + $0x60] sm:$0xff] %v2824_v49  ;;  %2446 = vst [vmem:[%s3888_s6 + $0x160] sm:$0xff] %v2856_v50  ;;  %v2825_v53 = vpack.c.bf16 %v1917_v51, %v1916_v45  ;;  %v2857_v54 = vpack.c.bf16 %v1981_v52, %v1980_v46 }
 0x1e0   : > { %2415 = vst [vmem:[%s3888_s6 + $0x68] sm:$0xff] %v2825_v53  ;;  %2447 = vst [vmem:[%s3888_s6 + $0x168] sm:$0xff] %v2857_v54  ;;  %v1242_v55 = vpop.f32.mrb[28].mxu0  ;;  %v1402_v56 = vpop.f32.mrb[28].mxu1 }
 0x1e1   : > { %v1918_v57 = vadd.f32 %v3873_v37, %v1242_v55  ;;  %v1982_v58 = vadd.f32 %v3873_v37, %v1402_v56  ;;  %v1244_v59 = vpop.f32.mrb[29].mxu0  ;;  %v1404_v60 = vpop.f32.mrb[29].mxu1 }
 0x1e2   : > { %v1919_v61 = vadd.f32 %v3876_v38, %v1244_v59  ;;  %v1983_v62 = vadd.f32 %v3876_v38, %v1404_v60  ;;  %v1246_v63 = vpop.f32.mrb[30].mxu0  ;;  %v1406_v0 = vpop.f32.mrb[30].mxu1 }
 0x1e3   : > { %v1920_v1 = vadd.f32 %v3873_v37, %v1246_v63  ;;  %v1984_v2 = vadd.f32 %v3873_v37, %v1406_v0  ;;  %v1248_v3 = vpop.f32.mrb[31].mxu0  ;;  %v1408_v4 = vpop.f32.mrb[31].mxu1 }
 0x1e4   : > { %v2826_v5 = vpack.c.bf16 %v1919_v61, %v1918_v57  ;;  %v2858_v6 = vpack.c.bf16 %v1983_v62, %v1982_v58  ;;  %v1921_v7 = vadd.f32 %v3876_v38, %v1248_v3  ;;  %v1985_v8 = vadd.f32 %v3876_v38, %v1408_v4 }
 0x1e6   : > { %2416 = vst [vmem:[%s3888_s6 + $0x70] sm:$0xff] %v2826_v5  ;;  %2448 = vst [vmem:[%s3888_s6 + $0x170] sm:$0xff] %v2858_v6  ;;  %v2827_v9 = vpack.c.bf16 %v1921_v7, %v1920_v1  ;;  %v2859_v10 = vpack.c.bf16 %v1985_v8, %v1984_v2 }
 0x1e8   : > { %2417 = vst [vmem:[%s3888_s6 + $0x78] sm:$0xff] %v2827_v9  ;;  %2449 = vst [vmem:[%s3888_s6 + $0x178] sm:$0xff] %v2859_v10  ;;  %v1252_v11 = vpop.f32.mrb[32].mxu0  ;;  %v1412_v12 = vpop.f32.mrb[32].mxu1 }
 0x1e9   : > { %v1922_v13 = vadd.f32 %v3873_v37, %v1252_v11  ;;  %v1986_v14 = vadd.f32 %v3873_v37, %v1412_v12  ;;  %v1254_v15 = vpop.f32.mrb[33].mxu0  ;;  %v1414_v16 = vpop.f32.mrb[33].mxu1 }
 0x1ea   : > { %v1923_v17 = vadd.f32 %v3876_v38, %v1254_v15  ;;  %v1987_v18 = vadd.f32 %v3876_v38, %v1414_v16  ;;  %v1256_v19 = vpop.f32.mrb[34].mxu0  ;;  %v1416_v20 = vpop.f32.mrb[34].mxu1 }
 0x1eb   : > { %v1924_v21 = vadd.f32 %v3873_v37, %v1256_v19  ;;  %v1988_v22 = vadd.f32 %v3873_v37, %v1416_v20  ;;  %v1258_v23 = vpop.f32.mrb[35].mxu0  ;;  %v1418_v24 = vpop.f32.mrb[35].mxu1 }
 0x1ec   : > { %v2828_v25 = vpack.c.bf16 %v1923_v17, %v1922_v13  ;;  %v2860_v26 = vpack.c.bf16 %v1987_v18, %v1986_v14  ;;  %v1925_v27 = vadd.f32 %v3876_v38, %v1258_v23  ;;  %v1989_v28 = vadd.f32 %v3876_v38, %v1418_v24 }
 0x1ee   : > { %2418 = vst [vmem:[%s3888_s6 + $0x80] sm:$0xff] %v2828_v25  ;;  %2450 = vst [vmem:[%s3888_s6 + $0x180] sm:$0xff] %v2860_v26  ;;  %v2829_v29 = vpack.c.bf16 %v1925_v27, %v1924_v21  ;;  %v2861_v30 = vpack.c.bf16 %v1989_v28, %v1988_v22 }
 0x1f0   : > { %2419 = vst [vmem:[%s3888_s6 + $0x88] sm:$0xff] %v2829_v29  ;;  %2451 = vst [vmem:[%s3888_s6 + $0x188] sm:$0xff] %v2861_v30  ;;  %v1262_v31 = vpop.f32.mrb[36].mxu0  ;;  %v1422_v32 = vpop.f32.mrb[36].mxu1 }
 0x1f1   : > { %v1926_v33 = vadd.f32 %v3873_v37, %v1262_v31  ;;  %v1990_v34 = vadd.f32 %v3873_v37, %v1422_v32  ;;  %v1264_v35 = vpop.f32.mrb[37].mxu0  ;;  %v1424_v36 = vpop.f32.mrb[37].mxu1 }
 0x1f2   : > { %v1927_v39 = vadd.f32 %v3876_v38, %v1264_v35  ;;  %v1991_v40 = vadd.f32 %v3876_v38, %v1424_v36  ;;  %v1266_v41 = vpop.f32.mrb[38].mxu0  ;;  %v1426_v42 = vpop.f32.mrb[38].mxu1 }
 0x1f3   : > { %v1928_v43 = vadd.f32 %v3873_v37, %v1266_v41  ;;  %v1992_v44 = vadd.f32 %v3873_v37, %v1426_v42  ;;  %v1268_v45 = vpop.f32.mrb[39].mxu0  ;;  %v1428_v46 = vpop.f32.mrb[39].mxu1 }
 0x1f4   : > { %v2830_v47 = vpack.c.bf16 %v1927_v39, %v1926_v33  ;;  %v2862_v48 = vpack.c.bf16 %v1991_v40, %v1990_v34  ;;  %v1929_v49 = vadd.f32 %v3876_v38, %v1268_v45  ;;  %v1993_v50 = vadd.f32 %v3876_v38, %v1428_v46 }
 0x1f6   : > { %2420 = vst [vmem:[%s3888_s6 + $0x90] sm:$0xff] %v2830_v47  ;;  %2452 = vst [vmem:[%s3888_s6 + $0x190] sm:$0xff] %v2862_v48  ;;  %v2831_v51 = vpack.c.bf16 %v1929_v49, %v1928_v43  ;;  %v2863_v52 = vpack.c.bf16 %v1993_v50, %v1992_v44 }
 0x1f8   : > { %2421 = vst [vmem:[%s3888_s6 + $0x98] sm:$0xff] %v2831_v51  ;;  %2453 = vst [vmem:[%s3888_s6 + $0x198] sm:$0xff] %v2863_v52  ;;  %v1272_v53 = vpop.f32.mrb[40].mxu0  ;;  %v1432_v54 = vpop.f32.mrb[40].mxu1 }
 0x1f9   : > { %v1930_v55 = vadd.f32 %v3873_v37, %v1272_v53  ;;  %v1994_v56 = vadd.f32 %v3873_v37, %v1432_v54  ;;  %v1274_v57 = vpop.f32.mrb[41].mxu0  ;;  %v1434_v58 = vpop.f32.mrb[41].mxu1 }
 0x1fa   : > { %v1931_v59 = vadd.f32 %v3876_v38, %v1274_v57  ;;  %v1995_v60 = vadd.f32 %v3876_v38, %v1434_v58  ;;  %v1276_v61 = vpop.f32.mrb[42].mxu0  ;;  %v1436_v62 = vpop.f32.mrb[42].mxu1 }
 0x1fb   : > { %v1932_v63 = vadd.f32 %v3873_v37, %v1276_v61  ;;  %v1996_v0 = vadd.f32 %v3873_v37, %v1436_v62  ;;  %v1278_v1 = vpop.f32.mrb[43].mxu0  ;;  %v1438_v2 = vpop.f32.mrb[43].mxu1 }
 0x1fc   : > { %v2832_v3 = vpack.c.bf16 %v1931_v59, %v1930_v55  ;;  %v2864_v4 = vpack.c.bf16 %v1995_v60, %v1994_v56  ;;  %v1933_v5 = vadd.f32 %v3876_v38, %v1278_v1  ;;  %v1997_v6 = vadd.f32 %v3876_v38, %v1438_v2 }
 0x1fe   : > { %2422 = vst [vmem:[%s3888_s6 + $0xa0] sm:$0xff] %v2832_v3  ;;  %2454 = vst [vmem:[%s3888_s6 + $0x1a0] sm:$0xff] %v2864_v4  ;;  %v2833_v7 = vpack.c.bf16 %v1933_v5, %v1932_v63  ;;  %v2865_v8 = vpack.c.bf16 %v1997_v6, %v1996_v0 }
 0x200   : > { %2423 = vst [vmem:[%s3888_s6 + $0xa8] sm:$0xff] %v2833_v7  ;;  %2455 = vst [vmem:[%s3888_s6 + $0x1a8] sm:$0xff] %v2865_v8  ;;  %v1282_v9 = vpop.f32.mrb[44].mxu0  ;;  %v1442_v10 = vpop.f32.mrb[44].mxu1 }
 0x201   : > { %v1934_v11 = vadd.f32 %v3873_v37, %v1282_v9  ;;  %v1998_v12 = vadd.f32 %v3873_v37, %v1442_v10  ;;  %v1284_v13 = vpop.f32.mrb[45].mxu0  ;;  %v1444_v14 = vpop.f32.mrb[45].mxu1 }
 0x202   : > { %v1935_v15 = vadd.f32 %v3876_v38, %v1284_v13  ;;  %v1999_v16 = vadd.f32 %v3876_v38, %v1444_v14  ;;  %v1286_v17 = vpop.f32.mrb[46].mxu0  ;;  %v1446_v18 = vpop.f32.mrb[46].mxu1 }
 0x203   : > { %v1936_v19 = vadd.f32 %v3873_v37, %v1286_v17  ;;  %v2000_v20 = vadd.f32 %v3873_v37, %v1446_v18  ;;  %v1288_v21 = vpop.f32.mrb[47].mxu0  ;;  %v1448_v22 = vpop.f32.mrb[47].mxu1 }
 0x204   : > { %v2834_v23 = vpack.c.bf16 %v1935_v15, %v1934_v11  ;;  %v2866_v24 = vpack.c.bf16 %v1999_v16, %v1998_v12  ;;  %v1937_v25 = vadd.f32 %v3876_v38, %v1288_v21  ;;  %v2001_v26 = vadd.f32 %v3876_v38, %v1448_v22 }
 0x206   : > { %2424 = vst [vmem:[%s3888_s6 + $0xb0] sm:$0xff] %v2834_v23  ;;  %2456 = vst [vmem:[%s3888_s6 + $0x1b0] sm:$0xff] %v2866_v24  ;;  %v2835_v27 = vpack.c.bf16 %v1937_v25, %v1936_v19  ;;  %v2867_v28 = vpack.c.bf16 %v2001_v26, %v2000_v20 }
 0x208   : > { %2425 = vst [vmem:[%s3888_s6 + $0xb8] sm:$0xff] %v2835_v27  ;;  %2457 = vst [vmem:[%s3888_s6 + $0x1b8] sm:$0xff] %v2867_v28  ;;  %v1292_v29 = vpop.f32.mrb[48].mxu0  ;;  %v1452_v30 = vpop.f32.mrb[48].mxu1 }
 0x209   : > { %v1938_v31 = vadd.f32 %v3873_v37, %v1292_v29  ;;  %v2002_v32 = vadd.f32 %v3873_v37, %v1452_v30  ;;  %v1294_v33 = vpop.f32.mrb[49].mxu0  ;;  %v1454_v34 = vpop.f32.mrb[49].mxu1 }
 0x20a   : > { %v1939_v35 = vadd.f32 %v3876_v38, %v1294_v33  ;;  %v2003_v36 = vadd.f32 %v3876_v38, %v1454_v34  ;;  %v1296_v39 = vpop.f32.mrb[50].mxu0  ;;  %v1456_v40 = vpop.f32.mrb[50].mxu1 }
 0x20b   : > { %v1940_v41 = vadd.f32 %v3873_v37, %v1296_v39  ;;  %v2004_v42 = vadd.f32 %v3873_v37, %v1456_v40  ;;  %v1298_v43 = vpop.f32.mrb[51].mxu0  ;;  %v1458_v44 = vpop.f32.mrb[51].mxu1 }
 0x20c   : > { %v2836_v45 = vpack.c.bf16 %v1939_v35, %v1938_v31  ;;  %v2868_v46 = vpack.c.bf16 %v2003_v36, %v2002_v32  ;;  %v1941_v47 = vadd.f32 %v3876_v38, %v1298_v43  ;;  %v2005_v48 = vadd.f32 %v3876_v38, %v1458_v44 }
 0x20e   : > { %2426 = vst [vmem:[%s3888_s6 + $0xc0] sm:$0xff] %v2836_v45  ;;  %2458 = vst [vmem:[%s3888_s6 + $0x1c0] sm:$0xff] %v2868_v46  ;;  %v2837_v49 = vpack.c.bf16 %v1941_v47, %v1940_v41  ;;  %v2869_v50 = vpack.c.bf16 %v2005_v48, %v2004_v42 }
 0x210   : > { %2427 = vst [vmem:[%s3888_s6 + $0xc8] sm:$0xff] %v2837_v49  ;;  %2459 = vst [vmem:[%s3888_s6 + $0x1c8] sm:$0xff] %v2869_v50  ;;  %v1302_v51 = vpop.f32.mrb[52].mxu0  ;;  %v1462_v52 = vpop.f32.mrb[52].mxu1 }
 0x211   : > { %v1942_v53 = vadd.f32 %v3873_v37, %v1302_v51  ;;  %v2006_v54 = vadd.f32 %v3873_v37, %v1462_v52  ;;  %v1304_v55 = vpop.f32.mrb[53].mxu0  ;;  %v1464_v56 = vpop.f32.mrb[53].mxu1 }
 0x212   : > { %v1943_v57 = vadd.f32 %v3876_v38, %v1304_v55  ;;  %v2007_v58 = vadd.f32 %v3876_v38, %v1464_v56  ;;  %v1306_v59 = vpop.f32.mrb[54].mxu0  ;;  %v1466_v60 = vpop.f32.mrb[54].mxu1 }
 0x213   : > { %v1944_v61 = vadd.f32 %v3873_v37, %v1306_v59  ;;  %v2008_v62 = vadd.f32 %v3873_v37, %v1466_v60  ;;  %v1308_v63 = vpop.f32.mrb[55].mxu0  ;;  %v1468_v0 = vpop.f32.mrb[55].mxu1 }
 0x214   : > { %v2838_v1 = vpack.c.bf16 %v1943_v57, %v1942_v53  ;;  %v2870_v2 = vpack.c.bf16 %v2007_v58, %v2006_v54  ;;  %v1945_v3 = vadd.f32 %v3876_v38, %v1308_v63  ;;  %v2009_v4 = vadd.f32 %v3876_v38, %v1468_v0 }
 0x216   : > { %2428 = vst [vmem:[%s3888_s6 + $0xd0] sm:$0xff] %v2838_v1  ;;  %2460 = vst [vmem:[%s3888_s6 + $0x1d0] sm:$0xff] %v2870_v2  ;;  %v2839_v5 = vpack.c.bf16 %v1945_v3, %v1944_v61  ;;  %v2871_v6 = vpack.c.bf16 %v2009_v4, %v2008_v62 }
 0x218   : > { %2429 = vst [vmem:[%s3888_s6 + $0xd8] sm:$0xff] %v2839_v5  ;;  %2461 = vst [vmem:[%s3888_s6 + $0x1d8] sm:$0xff] %v2871_v6  ;;  %v1312_v7 = vpop.f32.mrb[56].mxu0  ;;  %v1472_v8 = vpop.f32.mrb[56].mxu1 }
 0x219   : > { %v1946_v9 = vadd.f32 %v3873_v37, %v1312_v7  ;;  %v2010_v10 = vadd.f32 %v3873_v37, %v1472_v8  ;;  %v1314_v11 = vpop.f32.mrb[57].mxu0  ;;  %v1474_v12 = vpop.f32.mrb[57].mxu1 }
 0x21a   : > { %v1947_v13 = vadd.f32 %v3876_v38, %v1314_v11  ;;  %v2011_v14 = vadd.f32 %v3876_v38, %v1474_v12  ;;  %v1316_v15 = vpop.f32.mrb[58].mxu0  ;;  %v1476_v16 = vpop.f32.mrb[58].mxu1 }
 0x21b   : > { %v1948_v17 = vadd.f32 %v3873_v37, %v1316_v15  ;;  %v2012_v18 = vadd.f32 %v3873_v37, %v1476_v16  ;;  %v1318_v19 = vpop.f32.mrb[59].mxu0  ;;  %v1478_v20 = vpop.f32.mrb[59].mxu1 }
 0x21c   : > { %v2840_v21 = vpack.c.bf16 %v1947_v13, %v1946_v9  ;;  %v2872_v22 = vpack.c.bf16 %v2011_v14, %v2010_v10  ;;  %v1949_v23 = vadd.f32 %v3876_v38, %v1318_v19  ;;  %v2013_v24 = vadd.f32 %v3876_v38, %v1478_v20 }
 0x21e   : > { %2430 = vst [vmem:[%s3888_s6 + $0xe0] sm:$0xff] %v2840_v21  ;;  %2462 = vst [vmem:[%s3888_s6 + $0x1e0] sm:$0xff] %v2872_v22  ;;  %v2841_v25 = vpack.c.bf16 %v1949_v23, %v1948_v17  ;;  %v2873_v26 = vpack.c.bf16 %v2013_v24, %v2012_v18 }
 0x220   : > { %2431 = vst [vmem:[%s3888_s6 + $0xe8] sm:$0xff] %v2841_v25  ;;  %2463 = vst [vmem:[%s3888_s6 + $0x1e8] sm:$0xff] %v2873_v26  ;;  %v1322_v27 = vpop.f32.mrb[60].mxu0  ;;  %v1482_v28 = vpop.f32.mrb[60].mxu1 }
 0x221   : > { %v1950_v29 = vadd.f32 %v3873_v37, %v1322_v27  ;;  %v2014_v30 = vadd.f32 %v3873_v37, %v1482_v28  ;;  %v1324_v31 = vpop.f32.mrb[61].mxu0  ;;  %v1484_v32 = vpop.f32.mrb[61].mxu1 }
 0x222   : > { %v1951_v33 = vadd.f32 %v3876_v38, %v1324_v31  ;;  %v2015_v34 = vadd.f32 %v3876_v38, %v1484_v32  ;;  %v1326_v35 = vpop.f32.mrb[62].mxu0  ;;  %v1486_v36 = vpop.f32.mrb[62].mxu1 }
 0x223   : > { %v1952_v39 = vadd.f32 %v3873_v37, %v1326_v35  ;;  %v2016_v40 = vadd.f32 %v3873_v37, %v1486_v36  ;;  %v1328_v41 = vpop.f32.mrb[63].mxu0  ;;  %v1488_v42 = vpop.f32.mrb[63].mxu1 }
 0x224   : > { %v2842_v43 = vpack.c.bf16 %v1951_v33, %v1950_v29  ;;  %v2874_v44 = vpack.c.bf16 %v2015_v34, %v2014_v30  ;;  %v1953_v45 = vadd.f32 %v3876_v38, %v1328_v41  ;;  %v2017_v46 = vadd.f32 %v3876_v38, %v1488_v42 }
 0x226   : > { %2432 = vst [vmem:[%s3888_s6 + $0xf0] sm:$0xff] %v2842_v43  ;;  %2464 = vst [vmem:[%s3888_s6 + $0x1f0] sm:$0xff] %v2874_v44  ;;  %v2843_v37 = vpack.c.bf16 %v1953_v45, %v1952_v39  ;;  %v2875_v47 = vpack.c.bf16 %v2017_v46, %v2016_v40 }
 0x228   : > { %2433 = vst [vmem:[%s3888_s6 + $0xf8] sm:$0xff] %v2843_v37  ;;  %2465 = vst [vmem:[%s3888_s6 + $0x1f8] sm:$0xff] %v2875_v47 }
 0x229   : > { %3298 = shalt.err (!%p3295_p1)
}
 0x22a   : > { %s3299_s7 = scalar_lea.hbm %s4076_s15, 8192  ;;  %s3303_s10 = scalar_lea.hbm %s4223_s26, 49152 }
 0x22b   : > { %p3300_p0 = scmp.ne.s32.totalorder %s4076_s15, %s3299_s7  ;;  %p3304_p8 = scmp.lt.u32.totalorder %s4076_s15, %s4223_s26 }
 0x22c   : > { %p3305_p10 = scmp.lt.u32.totalorder %s3303_s10, %s3299_s7  ;;  %p3307_p7 = scmp.lt.u32.totalorder %s3299_s7, %s4076_s15 }
 0x22d   : > { %p3301_p12 = pnand %p3300_p0, %p4224_p11 }
 0x22e   : > { %p3306_p6 = por %p3305_p10, %p3304_p8 }
 0x22f   : > { %p3302_p13 = pneg %p3301_p12 }
 0x230   : > { %p3308_p5 = por %p3307_p7, %p3306_p6 }
 0x232   : > { %p3309_p2 = pnand %p3308_p5, %p3302_p13 }
 0x234   : > { %3312 = shalt.err (!%p3309_p2)
}
 0x235   : > { %s3444_s1 = smov 128   ;;  %s3445_s17 = smov 384  }
 0x236   : > { %s3446_s22 = smov 8  }
 0x237   : > { %2915 = dma.vmem_to_hbm [thread:$0]  (%p4224_p11), %s4078_s21, 8192, %s4076_s15, %s4086_s30, %s3444_s1, %s3445_s17, %s3446_s22  }
 0x238 PF: > { %p2932_p3 = scmp.ge.s32.totalorder %s3435_s25, 2  ;;  %s2498_s3 = sand.u32 1, %s3383_s12  }
 0x239   : > { %p4225_p9 = scmp.ne.s32.totalorder %s4209_s8, 0  ;;  %s2499_s20 = scalar_lea.sflag [#allocation5], %s2498_s3 }
 0x23b   : > { %p2928_p4 = pnand %p2932_p3, %p4225_p9 }
 0x23d   : > { %3378 = dma.done.wait (!%p2928_p4), %s2499_s20, 8192  }
 0x23e   : > { %3380 = vsyncadd (!%p2928_p4), %s2499_s20, 4294959104  ;;  %s22_s25 = sadd.s32 1, %s3435_s25   ;;  %s4227_s28 = sld [smem:[#allocation13_spill]] }
 0x23f   : > { %p4115_p1 = scmp.ge.s32.totalorder %s22_s25, 8   ;;  %s4228_s14 = sld [smem:[#allocation24_spill]] }
 0x240   : > { %s4229_s21 = sld [smem:[#allocation14_spill]]  ;;  %s4230_s17 = sld [smem:[#allocation22_spill]] }
 0x241   : > { %s4231_s23 = sld [smem:[#allocation15_spill]]  ;;  %s4232_s20 = sld [smem:[#allocation23_spill]] }
 0x242   : > { %s4233_s8 = sld [smem:[#allocation18_spill]]  ;;  %s4234_s22 = sld [smem:[#allocation19_spill]] }
 0x243   : > { %s4235_s30 = sld [smem:[#allocation20_spill]]  ;;  %s4236_s24 = sld [smem:[#allocation21_spill]] }
 0x244   : > { %s4237_s12 = smov %s3387_s13  ;;  %s4238_s13 = smov %s4227_s28 }
 0x245   : > { %s4239_s15 = smov %s3399_s16  ;;  %s4241_s18 = smov %s3411_s19 }
 0x246   : > { %s4240_s16 = smov %s4229_s21  ;;  %21 = sbr.rel (!%p4115_p1) target bundleno = 15 (0xf), region = 109 }
 0x247   : > { %s4242_s19 = smov %s4231_s23 }
 0x248   : > { %s4243_s21 = smov %s4233_s8 }
 0x249   : > { %s4244_s23 = smov %s4235_s30 }
 0x24d   :  { %2504 = vsyncpa [#allocation4], 1 }
 0x24e   :  { %2506 = vsyncpa [#allocation4 + $0x1], 1 }
 0x24f   :  { %2507 = vsyncpa [#allocation7], 1 }
 0x250   :  { %2509 = vsyncpa [#allocation7 + $0x1], 1 }
 0x251   :  { %2510 = vsyncpa [#allocation5], 1 }
 0x252   :  { %2512 = vsyncpa [#allocation5 + $0x1], 1 }

</bundles_post_ra>
